<compile_context>
chip_gen: v5e
topology: v5e:2x2
jax: 0.10.0
libtpu: 0.0.40
codegen_flags: <defaults>
</compile_context>

<pallas_src>
import functools
import math

import jax
import jax.numpy as jnp
from jax.experimental import pallas as pl
from jax.experimental.pallas import tpu as pltpu

# MXU input dtype; accumulation and all elementwise epilogues stay in f32.
MATMUL_DTYPE = jnp.bfloat16


# ----------------------------- tiling helpers -------------------------------

def _pick_mn_tile(dim, target):
    return dim if dim <= target else target


def _pick_k_tile(dim, target):
    """Largest multiple of 128 <= target that divides dim; else whole dim."""
    if dim <= target:
        return dim
    t = (target // 128) * 128
    while t >= 128:
        if dim % t == 0:
            return t
        t -= 128
    return dim


# ------------------------------- linear -------------------------------------

def _make_linear_kernel(n_k, has_bias, has_residual, transpose_rhs):
    def kernel(*refs):
        x_ref, w_ref = refs[0], refs[1]
        idx = 2
        b_ref = None
        r_ref = None
        if has_bias:
            b_ref = refs[idx]; idx += 1
        if has_residual:
            r_ref = refs[idx]; idx += 1
        o_ref, acc_ref = refs[idx], refs[idx + 1]

        @pl.when(pl.program_id(2) == 0)
        def _init():
            acc_ref[...] = jnp.zeros_like(acc_ref)

        x = x_ref[...]
        w = w_ref[...]
        if transpose_rhs:
            part = jax.lax.dot_general(x, w, (((1,), (1,)), ((), ())),
                                       preferred_element_type=jnp.float32)
        else:
            part = jnp.dot(x, w, preferred_element_type=jnp.float32)
        acc_ref[...] += part

        @pl.when(pl.program_id(2) == n_k - 1)
        def _epilogue():
            y = acc_ref[...]
            if has_bias:
                y = y + b_ref[...]
            if has_residual:
                y = y + r_ref[...].astype(jnp.float32)
            o_ref[...] = y.astype(o_ref.dtype)

    return kernel


def linear_pallas(x, w, b=None, residual=None, *, transpose_rhs=False,
                  out_dtype=None, tm=256, tn=256, tk=512):
    """y = x @ w (+ b) (+ residual).

    x: (..., K); w: (K, N) or (N, K) if transpose_rhs; b: (N,) or None;
    residual: same leading shape as x with last dim N (fused add before store).
    """
    lead = x.shape[:-1]
    K = x.shape[-1]
    N = w.shape[0] if transpose_rhs else w.shape[1]
    M = int(math.prod(lead)) if lead else 1
    out_dtype = out_dtype if out_dtype is not None else x.dtype

    x2 = x.reshape(M, K)
    tm = _pick_mn_tile(M, tm)
    tn = _pick_mn_tile(N, tn)
    tk = _pick_k_tile(K, tk)
    gm, gn, gk = pl.cdiv(M, tm), pl.cdiv(N, tn), K // tk

    has_bias = b is not None
    has_residual = residual is not None

    in_specs = [pl.BlockSpec((tm, tk), lambda i, j, k: (i, k))]
    if transpose_rhs:
        in_specs.append(pl.BlockSpec((tn, tk), lambda i, j, k: (j, k)))
    else:
        in_specs.append(pl.BlockSpec((tk, tn), lambda i, j, k: (k, j)))
    args = [x2, w]
    if has_bias:
        in_specs.append(pl.BlockSpec((1, tn), lambda i, j, k: (0, j)))
        args.append(b.reshape(1, N).astype(jnp.float32))
    if has_residual:
        in_specs.append(pl.BlockSpec((tm, tn), lambda i, j, k: (i, j)))
        args.append(residual.reshape(M, N))

    bytes_acc = int(M * K * jnp.dtype(x2.dtype).itemsize
                    + K * N * jnp.dtype(w.dtype).itemsize
                    + M * N * jnp.dtype(out_dtype).itemsize)
    if has_residual:
        bytes_acc += int(M * N * jnp.dtype(residual.dtype).itemsize)

    out = pl.pallas_call(
        _make_linear_kernel(gk, has_bias, has_residual, transpose_rhs),
        out_shape=jax.ShapeDtypeStruct((M, N), out_dtype),
        grid_spec=pltpu.PrefetchScalarGridSpec(
            num_scalar_prefetch=0,
            grid=(gm, gn, gk),
            in_specs=in_specs,
            out_specs=pl.BlockSpec((tm, tn), lambda i, j, k: (i, j)),
            scratch_shapes=[pltpu.VMEM((tm, tn), jnp.float32)]),
        compiler_params=pltpu.CompilerParams(
            dimension_semantics=("parallel", "parallel", "arbitrary")),
        cost_estimate=pl.CostEstimate(flops=2 * M * N * K, transcendentals=0,
                                      bytes_accessed=bytes_acc),
    )(*args)
    return out.reshape(*lead, N)


# ------------------------------ layernorm ------------------------------------

def _layernorm_kernel(x_ref, g_ref, b_ref, o_ref):
    x = x_ref[...].astype(jnp.float32)
    mu = jnp.mean(x, axis=-1, keepdims=True)
    xc = x - mu
    var = jnp.mean(xc * xc, axis=-1, keepdims=True)
    y = xc * jax.lax.rsqrt(var + 1e-5)
    o_ref[...] = (y * g_ref[...] + b_ref[...]).astype(o_ref.dtype)


def layernorm_pallas(x, g, b, *, out_dtype=None, tm=512):
    lead = x.shape[:-1]
    D = x.shape[-1]
    M = int(math.prod(lead)) if lead else 1
    out_dtype = out_dtype if out_dtype is not None else x.dtype
    tm = min(tm, M)
    out = pl.pallas_call(
        _layernorm_kernel,
        out_shape=jax.ShapeDtypeStruct((M, D), out_dtype),
        grid_spec=pl.GridSpec(
            grid=(pl.cdiv(M, tm),),
            in_specs=[pl.BlockSpec((tm, D), lambda i: (i, 0)),
                      pl.BlockSpec((1, D), lambda i: (0, 0)),
                      pl.BlockSpec((1, D), lambda i: (0, 0))],
            out_specs=pl.BlockSpec((tm, D), lambda i: (i, 0))),
        compiler_params=pltpu.CompilerParams(dimension_semantics=("parallel",)),
    )(x.reshape(M, D), g.reshape(1, D).astype(jnp.float32),
      b.reshape(1, D).astype(jnp.float32))
    return out.reshape(*lead, D)


# ------------------------------ attention ------------------------------------

def _make_attn_kernel(has_mask, scale):
    def kernel(*refs):
        if has_mask:
            q_ref, k_ref, v_ref, m_ref, o_ref = refs
        else:
            q_ref, k_ref, v_ref, o_ref = refs
            m_ref = None
        q = q_ref[0]          # (Hb, Sq, Dh)
        k = k_ref[0]          # (Hb, Sk, Dh)
        v = v_ref[0]
        s = jnp.einsum('hqd,hkd->hqk', q, k,
                       preferred_element_type=jnp.float32) * scale
        if has_mask:
            s = s + m_ref[...]
        s = s - jnp.max(s, axis=-1, keepdims=True)
        p = jnp.exp(s)
        denom = jnp.sum(p, axis=-1, keepdims=True)
        p = p * pl.reciprocal(denom, approx=True)
        o = jnp.einsum('hqk,hkd->hqd', p.astype(v.dtype), v,
                       preferred_element_type=jnp.float32)
        o_ref[0] = o.astype(o_ref.dtype)

    return kernel


def attention_pallas(q, k, v, mask):
    """q/k/v: (B, H, S, Dh). mask: (Sq, Sk) or None. Returns (B, H, Sq, Dh)."""
    B, H, Sq, Dh = q.shape
    Sk = k.shape[2]
    scale = float(Dh) ** (-0.5)          # == (Dh**-0.25 on q) * (Dh**-0.25 on k)
    # batch heads so the MXU sees Hb*Dh >= ~256 worth of work per grid step
    hb = min(H, max(1, 256 // max(Dh, 1)))
    while H % hb:
        hb -= 1
    has_mask = mask is not None

    in_specs = [pl.BlockSpec((1, hb, Sq, Dh), lambda bi, hi: (bi, hi, 0, 0)),
                pl.BlockSpec((1, hb, Sk, Dh), lambda bi, hi: (bi, hi, 0, 0)),
                pl.BlockSpec((1, hb, Sk, Dh), lambda bi, hi: (bi, hi, 0, 0))]
    args = [q, k, v]
    if has_mask:
        in_specs.append(pl.BlockSpec((Sq, Sk), lambda bi, hi: (0, 0)))
        args.append(mask.astype(jnp.float32))

    # TODO(synk): for very long KV (Whisper audio ctx) a flash-style KV-tiled
    # online softmax would bound the (Hb, Sq, Sk) score tile in VMEM.
    return pl.pallas_call(
        _make_attn_kernel(has_mask, scale),
        out_shape=jax.ShapeDtypeStruct((B, H, Sq, Dh), q.dtype),
        grid_spec=pl.GridSpec(
            grid=(B, H // hb),
            in_specs=in_specs,
            out_specs=pl.BlockSpec((1, hb, Sq, Dh), lambda bi, hi: (bi, hi, 0, 0))),
        compiler_params=pltpu.CompilerParams(
            dimension_semantics=("parallel", "parallel")),
    )(*args)


# ------------------------------ model (glue) ---------------------------------

def mha_forward(p, x_ln, residual, xa, mask, n_head):
    """MultiHeadAttention.forward (no kv_cache, ilm=None); residual add is
    fused into the output-projection kernel epilogue."""
    q = linear_pallas(x_ln, p["q_w"], p["q_b"], out_dtype=MATMUL_DTYPE)
    kv_src = x_ln if xa is None else xa
    k = linear_pallas(kv_src, p["k_w"], None, out_dtype=MATMUL_DTYPE)   # no bias
    v = linear_pallas(kv_src, p["v_w"], p["v_b"], out_dtype=MATMUL_DTYPE)

    B, Sq, D = q.shape
    Sk = k.shape[1]
    Dh = D // n_head
    # TODO(synk): the head split/merge transposes could be folded into the q/k/v
    # and output-projection kernels' out_specs to remove these relayout passes.
    qh = q.reshape(B, Sq, n_head, Dh).transpose(0, 2, 1, 3)
    kh = k.reshape(B, Sk, n_head, Dh).transpose(0, 2, 1, 3)
    vh = v.reshape(B, Sk, n_head, Dh).transpose(0, 2, 1, 3)

    o = attention_pallas(qh, kh, vh, mask)                 # (B, H, Sq, Dh)
    o = o.transpose(0, 2, 1, 3).reshape(B, Sq, D)
    return linear_pallas(o, p["o_w"], p["o_b"], residual=residual,
                         out_dtype=jnp.float32)


def block_forward(p, x, xa_mm, mask, n_head):
    """ResidualAttentionBlock.forward (cross_attention=True, eval mode)."""
    h = layernorm_pallas(x, p["attn_ln_g"], p["attn_ln_b"], out_dtype=MATMUL_DTYPE)
    x = mha_forward(p["attn"], h, x, None, mask, n_head)

    h = layernorm_pallas(x, p["cross_ln_g"], p["cross_ln_b"], out_dtype=MATMUL_DTYPE)
    x = mha_forward(p["cross"], h, x, xa_mm, None, n_head)

    h = layernorm_pallas(x, p["mlp_ln_g"], p["mlp_ln_b"], out_dtype=MATMUL_DTYPE)
    h = linear_pallas(h, p["mlp_w1"], p["mlp_b1"], out_dtype=MATMUL_DTYPE)
    # TODO(synk): exact-erf GELU kept as a plain-JAX elementwise pass (erf
    # lowering inside Mosaic kernels is not guaranteed); ideally fused into the
    # first MLP linear's epilogue.
    h = jax.nn.gelu(h.astype(jnp.float32), approximate=False).astype(MATMUL_DTYPE)
    x = linear_pallas(h, p["mlp_w2"], p["mlp_b2"], residual=x,
                      out_dtype=jnp.float32)
    return x


def soft_text_decoder_v2_forward(params, tokens, xa, *, n_head, n_prompts):
    """SoftTextDecoderV2.forward with kv_cache=None (eval)."""
    emb = params["token_embedding"]            # (V, D) f32 (gather + pos add)
    emb_mm = params["token_embedding_mm"]      # (V, D) bf16 for logits matmul
    D = emb.shape[1]
    B, T = tokens.shape

    x = emb[tokens]                                       # token gather
    le = jnp.broadcast_to(params["learned_embedding"][None], (B, n_prompts, D))
    x = jnp.concatenate([le, x], axis=1)                  # (B, P+T, D)
    S = x.shape[1]
    x = x + params["positional_embedding"][:S]            # V2: offset=0 over P+T
    x = x.astype(xa.dtype)                                # f32 residual stream

    xa_mm = xa.astype(MATMUL_DTYPE)                       # cast cross K/V src once
    mask = params["mask"][:S, :S]                         # causal incl. prompts

    for blk in params["blocks"]:
        x = block_forward(blk, x, xa_mm, mask, n_head)

    x = layernorm_pallas(x, params["ln_g"], params["ln_b"], out_dtype=MATMUL_DTYPE)
    # logits = x @ emb.T without materializing the transposed vocab table
    logits = linear_pallas(x, emb_mm, None, transpose_rhs=True,
                           out_dtype=jnp.float32)
    return logits


# --------------------------- deterministic init ------------------------------

def init_params(key, n_vocab, n_ctx, n_state, n_head, n_layer, n_prompts):
    def norm(k, shape, scale=0.02, dtype=jnp.float32):
        return (scale * jax.random.normal(k, shape, jnp.float32)).astype(dtype)

    keys = jax.random.split(key, 3 + n_layer)
    L = n_ctx + n_prompts
    idx = jnp.arange(L)
    mask = jnp.where(idx[None, :] > idx[:, None], -jnp.inf, 0.0).astype(jnp.float32)

    tok = norm(keys[0], (n_vocab, n_state))
    params = {
        "token_embedding": tok,
        "token_embedding_mm": tok.astype(MATMUL_DTYPE),
        "positional_embedding": norm(keys[1], (n_ctx, n_state)),
        "learned_embedding": jax.random.normal(keys[2], (n_prompts, n_state),
                                               jnp.float32),
        "ln_g": jnp.ones((n_state,), jnp.float32),
        "ln_b": jnp.zeros((n_state,), jnp.float32),
        "mask": mask,
        "blocks": [],
    }

    def attn_params(ks):
        return {
            "q_w": norm(ks[0], (n_state, n_state), dtype=MATMUL_DTYPE),
            "q_b": norm(ks[1], (n_state,)),
            "k_w": norm(ks[2], (n_state, n_state), dtype=MATMUL_DTYPE),
            "v_w": norm(ks[3], (n_state, n_state), dtype=MATMUL_DTYPE),
            "v_b": norm(ks[4], (n_state,)),
            "o_w": norm(ks[5], (n_state, n_state), dtype=MATMUL_DTYPE),
            "o_b": norm(ks[6], (n_state,)),
        }

    for li in range(n_layer):
        bk = jax.random.split(keys[3 + li], 18)
        blk = {
            "attn": attn_params(bk[0:7]),
            "attn_ln_g": jnp.ones((n_state,), jnp.float32),
            "attn_ln_b": jnp.zeros((n_state,), jnp.float32),
            "cross": attn_params(bk[7:14]),
            "cross_ln_g": jnp.ones((n_state,), jnp.float32),
            "cross_ln_b": jnp.zeros((n_state,), jnp.float32),
            "mlp_w1": norm(bk[14], (n_state, 4 * n_state), dtype=MATMUL_DTYPE),
            "mlp_b1": norm(bk[15], (4 * n_state,)),
            "mlp_w2": norm(bk[16], (4 * n_state, n_state), dtype=MATMUL_DTYPE),
            "mlp_b2": norm(bk[17], (n_state,)),
            "mlp_ln_g": jnp.ones((n_state,), jnp.float32),
            "mlp_ln_b": jnp.zeros((n_state,), jnp.float32),
        }
        params["blocks"].append(blk)
    return params


# ---------------------------------- main --------------------------------------

if __name__ == "__main__":
    n_vocab, n_ctx, n_state, n_head, n_layer, n_prompts = 96, 16, 32, 4, 2, 4
    B, T, Ta = 2, 8, 16   # Ta = number of encoded audio frames

    key = jax.random.PRNGKey(0)
    pkey, tkey, akey = jax.random.split(key, 3)

    params = init_params(pkey, n_vocab, n_ctx, n_state, n_head, n_layer, n_prompts)
    tokens = jax.random.randint(tkey, (B, T), 0, n_vocab, dtype=jnp.int32)
    xa = 0.1 * jax.random.normal(akey, (B, Ta, n_state), jnp.float32)

    fwd = jax.jit(functools.partial(
        soft_text_decoder_v2_forward, n_head=n_head, n_prompts=n_prompts))
    logits = fwd(params, tokens, xa)
    jax.block_until_ready(logits)

    assert logits.shape == (B, n_prompts + T, n_vocab), logits.shape
    assert logits.dtype == jnp.float32
    assert bool(jnp.all(jnp.isfinite(logits)))
    print("KERNEL_OK")
</pallas_src>

<mosaic_0001>
module attributes {stable_mosaic.version = 11 : i64} {
  func.func @_layernorm_kernel(%arg0: i32, %arg1: memref<24x32xf32, #tpu.memory_space<vmem>>, %arg2: memref<1x32xf32, #tpu.memory_space<vmem>>, %arg3: memref<1x32xf32, #tpu.memory_space<vmem>>, %arg4: memref<24x32xbf16, #tpu.memory_space<vmem>>) attributes {dimension_semantics = [#tpu.dimension_semantics<parallel>], iteration_bounds = array<i64: 1>, scalar_prefetch = 0 : i64, scratch_operands = 0 : i64, tpu.core_type = #tpu.core_type<tc>, window_params = [{transform_indices = @transform_0, window_bounds = array<i64: 24, 32>}, {pipeline_mode = #tpu.pipeline_mode<synchronous>, transform_indices = @transform_1, window_bounds = array<i64: 1, 32>}, {pipeline_mode = #tpu.pipeline_mode<synchronous>, transform_indices = @transform_2, window_bounds = array<i64: 1, 32>}, {transform_indices = @transform_3, window_bounds = array<i64: 24, 32>}]} {
    %c0 = arith.constant 0 : index
    %c0_0 = arith.constant 0 : index
    %0 = vector.load %arg1[%c0, %c0_0] : memref<24x32xf32, #tpu.memory_space<vmem>>, vector<24x32xf32>
    %cst = arith.constant dense<0.000000e+00> : vector<24xf32>
    %1 = vector.multi_reduction <add>, %0, %cst [1] : vector<24x32xf32> to vector<24xf32>
    %2 = vector.shape_cast %1 : vector<24xf32> to vector<24x1xf32>
    %cst_1 = arith.constant 3.200000e+01 : f32
    %3 = vector.broadcast %cst_1 : f32 to vector<24x1xf32>
    %4 = arith.divf %2, %3 : vector<24x1xf32>
    %5 = vector.broadcast %4 : vector<24x1xf32> to vector<24x32xf32>
    %6 = arith.subf %0, %5 : vector<24x32xf32>
    %7 = arith.mulf %6, %6 : vector<24x32xf32>
    %cst_2 = arith.constant dense<0.000000e+00> : vector<24xf32>
    %8 = vector.multi_reduction <add>, %7, %cst_2 [1] : vector<24x32xf32> to vector<24xf32>
    %9 = vector.shape_cast %8 : vector<24xf32> to vector<24x1xf32>
    %cst_3 = arith.constant 3.200000e+01 : f32
    %10 = vector.broadcast %cst_3 : f32 to vector<24x1xf32>
    %11 = arith.divf %9, %10 : vector<24x1xf32>
    %cst_4 = arith.constant 9.99999974E-6 : f32
    %12 = vector.broadcast %cst_4 : f32 to vector<24x1xf32>
    %13 = arith.addf %11, %12 : vector<24x1xf32>
    %14 = math.rsqrt %13 : vector<24x1xf32>
    %15 = vector.broadcast %14 : vector<24x1xf32> to vector<24x32xf32>
    %16 = arith.mulf %6, %15 : vector<24x32xf32>
    %c0_5 = arith.constant 0 : index
    %c0_6 = arith.constant 0 : index
    %17 = vector.load %arg2[%c0_5, %c0_6] : memref<1x32xf32, #tpu.memory_space<vmem>>, vector<1x32xf32>
    %18 = vector.broadcast %17 : vector<1x32xf32> to vector<24x32xf32>
    %19 = arith.mulf %16, %18 : vector<24x32xf32>
    %c0_7 = arith.constant 0 : index
    %c0_8 = arith.constant 0 : index
    %20 = vector.load %arg3[%c0_7, %c0_8] : memref<1x32xf32, #tpu.memory_space<vmem>>, vector<1x32xf32>
    %21 = vector.broadcast %20 : vector<1x32xf32> to vector<24x32xf32>
    %22 = arith.addf %19, %21 : vector<24x32xf32>
    %23 = arith.truncf %22 : vector<24x32xf32> to vector<24x32xbf16>
    %c0_9 = arith.constant 0 : index
    %c0_10 = arith.constant 0 : index
    %24 = vector.load %arg4[%c0_9, %c0_10] : memref<24x32xbf16, #tpu.memory_space<vmem>>, vector<24x32xbf16>
    tpu.vector_store %arg4[%c0_9, %c0_10], %23 {strides = array<i32>} : memref<24x32xbf16, #tpu.memory_space<vmem>>, vector<24x32xbf16>,
    return
  }
  func.func @transform_0(%arg0: i32) -> (i32, i32) {
    %c0_i32 = arith.constant 0 : i32
    %c0_i32_0 = arith.constant 0 : i32
    return %arg0, %c0_i32 : i32, i32
  }
  func.func @transform_1(%arg0: i32) -> (i32, i32) {
    %c0_i32 = arith.constant 0 : i32
    %c0_i32_0 = arith.constant 0 : i32
    %c0_i32_1 = arith.constant 0 : i32
    return %c0_i32, %c0_i32_0 : i32, i32
  }
  func.func @transform_2(%arg0: i32) -> (i32, i32) {
    %c0_i32 = arith.constant 0 : i32
    %c0_i32_0 = arith.constant 0 : i32
    %c0_i32_1 = arith.constant 0 : i32
    return %c0_i32, %c0_i32_0 : i32, i32
  }
  func.func @transform_3(%arg0: i32) -> (i32, i32) {
    %c0_i32 = arith.constant 0 : i32
    %c0_i32_0 = arith.constant 0 : i32
    return %arg0, %c0_i32 : i32, i32
  }
}

module attributes {stable_mosaic.version = 11 : i64} {
  func.func @kernel(%arg0: i32, %arg1: i32, %arg2: i32, %arg3: memref<24x32xbf16, #tpu.memory_space<vmem>>, %arg4: memref<32x32xbf16, #tpu.memory_space<vmem>>, %arg5: memref<1x32xf32, #tpu.memory_space<vmem>>, %arg6: memref<24x32xbf16, #tpu.memory_space<vmem>>, %arg7: memref<24x32xf32, #tpu.memory_space<vmem>>) attributes {dimension_semantics = [#tpu.dimension_semantics<parallel>, #tpu.dimension_semantics<parallel>, #tpu.dimension_semantics<arbitrary>], iteration_bounds = array<i64: 1, 1, 1>, scalar_prefetch = 0 : i64, scratch_operands = 1 : i64, tpu.core_type = #tpu.core_type<tc>, window_params = [{transform_indices = @transform_0, window_bounds = array<i64: 24, 32>}, {transform_indices = @transform_1, window_bounds = array<i64: 32, 32>}, {transform_indices = @transform_2, window_bounds = array<i64: 1, 32>}, {transform_indices = @transform_3, window_bounds = array<i64: 24, 32>}]} {
    %c0_i32 = arith.constant 0 : i32
    %0 = arith.cmpi eq, %arg2, %c0_i32 : i32
    %1 = arith.extui %0 : i1 to i32
    %c0_i32_0 = arith.constant 0 : i32
    %2 = arith.cmpi ne, %1, %c0_i32_0 : i32
    scf.if %2 {
      %cst_10 = arith.constant 0.000000e+00 : f32
      %12 = vector.broadcast %cst_10 : f32 to vector<24x32xf32>
      %c0_11 = arith.constant 0 : index
      %c0_12 = arith.constant 0 : index
      %13 = vector.load %arg7[%c0_11, %c0_12] : memref<24x32xf32, #tpu.memory_space<vmem>>, vector<24x32xf32>
      tpu.vector_store %arg7[%c0_11, %c0_12], %12 {strides = array<i32>} : memref<24x32xf32, #tpu.memory_space<vmem>>, vector<24x32xf32>,
    } else {
    }
    %c0 = arith.constant 0 : index
    %c0_1 = arith.constant 0 : index
    %3 = vector.load %arg3[%c0, %c0_1] : memref<24x32xbf16, #tpu.memory_space<vmem>>, vector<24x32xbf16>
    %c0_2 = arith.constant 0 : index
    %c0_3 = arith.constant 0 : index
    %4 = vector.load %arg4[%c0_2, %c0_3] : memref<32x32xbf16, #tpu.memory_space<vmem>>, vector<32x32xbf16>
    %cst = arith.constant dense<0.000000e+00> : vector<24x32xf32>
    %5 = tpu.matmul %3, %4, %cst {dimension_numbers = #tpu.dot_dimension_numbers<[1], [0], [0], [1], [0, 0, 1, 1], [], []>} : vector<24x32xbf16>, vector<32x32xbf16>, vector<24x32xf32> -> vector<24x32xf32>
    %c0_4 = arith.constant 0 : index
    %c0_5 = arith.constant 0 : index
    %6 = vector.load %arg7[%c0_4, %c0_5] : memref<24x32xf32, #tpu.memory_space<vmem>>, vector<24x32xf32>
    %7 = arith.addf %6, %5 : vector<24x32xf32>
    %c0_6 = arith.constant 0 : index
    %c0_7 = arith.constant 0 : index
    %8 = vector.load %arg7[%c0_6, %c0_7] : memref<24x32xf32, #tpu.memory_space<vmem>>, vector<24x32xf32>
    tpu.vector_store %arg7[%c0_6, %c0_7], %7 {strides = array<i32>} : memref<24x32xf32, #tpu.memory_space<vmem>>, vector<24x32xf32>,
    %c0_i32_8 = arith.constant 0 : i32
    %9 = arith.cmpi eq, %arg2, %c0_i32_8 : i32
    %10 = arith.extui %9 : i1 to i32
    %c0_i32_9 = arith.constant 0 : i32
    %11 = arith.cmpi ne, %10, %c0_i32_9 : i32
    scf.if %11 {
      %c0_10 = arith.constant 0 : index
      %c0_11 = arith.constant 0 : index
      %12 = vector.load %arg7[%c0_10, %c0_11] : memref<24x32xf32, #tpu.memory_space<vmem>>, vector<24x32xf32>
      %c0_12 = arith.constant 0 : index
      %c0_13 = arith.constant 0 : index
      %13 = vector.load %arg5[%c0_12, %c0_13] : memref<1x32xf32, #tpu.memory_space<vmem>>, vector<1x32xf32>
      %14 = vector.broadcast %13 : vector<1x32xf32> to vector<24x32xf32>
      %15 = arith.addf %12, %14 : vector<24x32xf32>
      %16 = arith.truncf %15 : vector<24x32xf32> to vector<24x32xbf16>
      %c0_14 = arith.constant 0 : index
      %c0_15 = arith.constant 0 : index
      %17 = vector.load %arg6[%c0_14, %c0_15] : memref<24x32xbf16, #tpu.memory_space<vmem>>, vector<24x32xbf16>
      tpu.vector_store %arg6[%c0_14, %c0_15], %16 {strides = array<i32>} : memref<24x32xbf16, #tpu.memory_space<vmem>>, vector<24x32xbf16>,
    } else {
    }
    return
  }
  func.func @transform_0(%arg0: i32, %arg1: i32, %arg2: i32) -> (i32, i32) {
    %c0_i32 = arith.constant 0 : i32
    return %arg0, %arg2 : i32, i32
  }
  func.func @transform_1(%arg0: i32, %arg1: i32, %arg2: i32) -> (i32, i32) {
    %c0_i32 = arith.constant 0 : i32
    return %arg2, %arg1 : i32, i32
  }
  func.func @transform_2(%arg0: i32, %arg1: i32, %arg2: i32) -> (i32, i32) {
    %c0_i32 = arith.constant 0 : i32
    %c0_i32_0 = arith.constant 0 : i32
    return %c0_i32, %arg1 : i32, i32
  }
  func.func @transform_3(%arg0: i32, %arg1: i32, %arg2: i32) -> (i32, i32) {
    %c0_i32 = arith.constant 0 : i32
    return %arg0, %arg1 : i32, i32
  }
}

module attributes {stable_mosaic.version = 11 : i64} {
  func.func @kernel(%arg0: i32, %arg1: i32, %arg2: i32, %arg3: memref<24x32xbf16, #tpu.memory_space<vmem>>, %arg4: memref<32x32xbf16, #tpu.memory_space<vmem>>, %arg5: memref<24x32xbf16, #tpu.memory_space<vmem>>, %arg6: memref<24x32xf32, #tpu.memory_space<vmem>>) attributes {dimension_semantics = [#tpu.dimension_semantics<parallel>, #tpu.dimension_semantics<parallel>, #tpu.dimension_semantics<arbitrary>], iteration_bounds = array<i64: 1, 1, 1>, scalar_prefetch = 0 : i64, scratch_operands = 1 : i64, tpu.core_type = #tpu.core_type<tc>, window_params = [{transform_indices = @transform_0, window_bounds = array<i64: 24, 32>}, {transform_indices = @transform_1, window_bounds = array<i64: 32, 32>}, {transform_indices = @transform_2, window_bounds = array<i64: 24, 32>}]} {
    %c0_i32 = arith.constant 0 : i32
    %0 = arith.cmpi eq, %arg2, %c0_i32 : i32
    %1 = arith.extui %0 : i1 to i32
    %c0_i32_0 = arith.constant 0 : i32
    %2 = arith.cmpi ne, %1, %c0_i32_0 : i32
    scf.if %2 {
      %cst_10 = arith.constant 0.000000e+00 : f32
      %12 = vector.broadcast %cst_10 : f32 to vector<24x32xf32>
      %c0_11 = arith.constant 0 : index
      %c0_12 = arith.constant 0 : index
      %13 = vector.load %arg6[%c0_11, %c0_12] : memref<24x32xf32, #tpu.memory_space<vmem>>, vector<24x32xf32>
      tpu.vector_store %arg6[%c0_11, %c0_12], %12 {strides = array<i32>} : memref<24x32xf32, #tpu.memory_space<vmem>>, vector<24x32xf32>,
    } else {
    }
    %c0 = arith.constant 0 : index
    %c0_1 = arith.constant 0 : index
    %3 = vector.load %arg3[%c0, %c0_1] : memref<24x32xbf16, #tpu.memory_space<vmem>>, vector<24x32xbf16>
    %c0_2 = arith.constant 0 : index
    %c0_3 = arith.constant 0 : index
    %4 = vector.load %arg4[%c0_2, %c0_3] : memref<32x32xbf16, #tpu.memory_space<vmem>>, vector<32x32xbf16>
    %cst = arith.constant dense<0.000000e+00> : vector<24x32xf32>
    %5 = tpu.matmul %3, %4, %cst {dimension_numbers = #tpu.dot_dimension_numbers<[1], [0], [0], [1], [0, 0, 1, 1], [], []>} : vector<24x32xbf16>, vector<32x32xbf16>, vector<24x32xf32> -> vector<24x32xf32>
    %c0_4 = arith.constant 0 : index
    %c0_5 = arith.constant 0 : index
    %6 = vector.load %arg6[%c0_4, %c0_5] : memref<24x32xf32, #tpu.memory_space<vmem>>, vector<24x32xf32>
    %7 = arith.addf %6, %5 : vector<24x32xf32>
    %c0_6 = arith.constant 0 : index
    %c0_7 = arith.constant 0 : index
    %8 = vector.load %arg6[%c0_6, %c0_7] : memref<24x32xf32, #tpu.memory_space<vmem>>, vector<24x32xf32>
    tpu.vector_store %arg6[%c0_6, %c0_7], %7 {strides = array<i32>} : memref<24x32xf32, #tpu.memory_space<vmem>>, vector<24x32xf32>,
    %c0_i32_8 = arith.constant 0 : i32
    %9 = arith.cmpi eq, %arg2, %c0_i32_8 : i32
    %10 = arith.extui %9 : i1 to i32
    %c0_i32_9 = arith.constant 0 : i32
    %11 = arith.cmpi ne, %10, %c0_i32_9 : i32
    scf.if %11 {
      %c0_10 = arith.constant 0 : index
      %c0_11 = arith.constant 0 : index
      %12 = vector.load %arg6[%c0_10, %c0_11] : memref<24x32xf32, #tpu.memory_space<vmem>>, vector<24x32xf32>
      %13 = arith.truncf %12 : vector<24x32xf32> to vector<24x32xbf16>
      %c0_12 = arith.constant 0 : index
      %c0_13 = arith.constant 0 : index
      %14 = vector.load %arg5[%c0_12, %c0_13] : memref<24x32xbf16, #tpu.memory_space<vmem>>, vector<24x32xbf16>
      tpu.vector_store %arg5[%c0_12, %c0_13], %13 {strides = array<i32>} : memref<24x32xbf16, #tpu.memory_space<vmem>>, vector<24x32xbf16>,
    } else {
    }
    return
  }
  func.func @transform_0(%arg0: i32, %arg1: i32, %arg2: i32) -> (i32, i32) {
    %c0_i32 = arith.constant 0 : i32
    return %arg0, %arg2 : i32, i32
  }
  func.func @transform_1(%arg0: i32, %arg1: i32, %arg2: i32) -> (i32, i32) {
    %c0_i32 = arith.constant 0 : i32
    return %arg2, %arg1 : i32, i32
  }
  func.func @transform_2(%arg0: i32, %arg1: i32, %arg2: i32) -> (i32, i32) {
    %c0_i32 = arith.constant 0 : i32
    return %arg0, %arg1 : i32, i32
  }
}

module attributes {stable_mosaic.version = 11 : i64} {
  func.func @kernel(%arg0: i32, %arg1: i32, %arg2: memref<1x4x12x8xbf16, #tpu.memory_space<vmem>>, %arg3: memref<1x4x12x8xbf16, #tpu.memory_space<vmem>>, %arg4: memref<1x4x12x8xbf16, #tpu.memory_space<vmem>>, %arg5: memref<12x12xf32, #tpu.memory_space<vmem>>, %arg6: memref<1x4x12x8xbf16, #tpu.memory_space<vmem>>) attributes {dimension_semantics = [#tpu.dimension_semantics<parallel>, #tpu.dimension_semantics<parallel>], iteration_bounds = array<i64: 2, 1>, scalar_prefetch = 0 : i64, scratch_operands = 0 : i64, tpu.core_type = #tpu.core_type<tc>, window_params = [{transform_indices = @transform_0, window_bounds = array<i64: 1, 4, 12, 8>}, {transform_indices = @transform_1, window_bounds = array<i64: 1, 4, 12, 8>}, {transform_indices = @transform_2, window_bounds = array<i64: 1, 4, 12, 8>}, {pipeline_mode = #tpu.pipeline_mode<synchronous>, transform_indices = @transform_3, window_bounds = array<i64: 12, 12>}, {transform_indices = @transform_4, window_bounds = array<i64: 1, 4, 12, 8>}]} {
    %c0 = arith.constant 0 : index
    %c0_0 = arith.constant 0 : index
    %c0_1 = arith.constant 0 : index
    %c0_2 = arith.constant 0 : index
    %0 = vector.load %arg2[%c0, %c0_0, %c0_1, %c0_2] : memref<1x4x12x8xbf16, #tpu.memory_space<vmem>>, vector<1x4x12x8xbf16>
    %1 = vector.shape_cast %0 : vector<1x4x12x8xbf16> to vector<4x12x8xbf16>
    %c0_3 = arith.constant 0 : index
    %c0_4 = arith.constant 0 : index
    %c0_5 = arith.constant 0 : index
    %c0_6 = arith.constant 0 : index
    %2 = vector.load %arg3[%c0_3, %c0_4, %c0_5, %c0_6] : memref<1x4x12x8xbf16, #tpu.memory_space<vmem>>, vector<1x4x12x8xbf16>
    %3 = vector.shape_cast %2 : vector<1x4x12x8xbf16> to vector<4x12x8xbf16>
    %c0_7 = arith.constant 0 : index
    %c0_8 = arith.constant 0 : index
    %c0_9 = arith.constant 0 : index
    %c0_10 = arith.constant 0 : index
    %4 = vector.load %arg4[%c0_7, %c0_8, %c0_9, %c0_10] : memref<1x4x12x8xbf16, #tpu.memory_space<vmem>>, vector<1x4x12x8xbf16>
    %5 = vector.shape_cast %4 : vector<1x4x12x8xbf16> to vector<4x12x8xbf16>
    "tpu.trace_start"() <{level = 10 : i32, message = "hqd,hkd->hqk"}> : () -> ()
    %cst = arith.constant dense<0.000000e+00> : vector<4x12x12xf32>
    %6 = tpu.matmul %1, %3, %cst {dimension_numbers = #tpu.dot_dimension_numbers<[2], [2], [1], [1], [0, 0, 0, 1, 1, 1], [0], [0]>} : vector<4x12x8xbf16>, vector<4x12x8xbf16>, vector<4x12x12xf32> -> vector<4x12x12xf32>
    "tpu.trace_stop"() : () -> ()
    %cst_11 = arith.constant 0.353553385 : f32
    %7 = vector.broadcast %cst_11 : f32 to vector<4x12x12xf32>
    %8 = arith.mulf %6, %7 : vector<4x12x12xf32>
    %c0_12 = arith.constant 0 : index
    %c0_13 = arith.constant 0 : index
    %9 = vector.load %arg5[%c0_12, %c0_13] : memref<12x12xf32, #tpu.memory_space<vmem>>, vector<12x12xf32>
    %10 = vector.shape_cast %9 : vector<12x12xf32> to vector<1x12x12xf32>
    %11 = vector.broadcast %10 : vector<1x12x12xf32> to vector<4x12x12xf32>
    %12 = arith.addf %8, %11 : vector<4x12x12xf32>
    %cst_14 = arith.constant dense<0xFF800000> : vector<4x12xf32>
    %13 = vector.multi_reduction <maximumf>, %12, %cst_14 [2] : vector<4x12x12xf32> to vector<4x12xf32>
    %14 = vector.shape_cast %13 : vector<4x12xf32> to vector<4x12x1xf32>
    %15 = vector.broadcast %14 : vector<4x12x1xf32> to vector<4x12x12xf32>
    %16 = arith.subf %12, %15 : vector<4x12x12xf32>
    %17 = math.exp %16 : vector<4x12x12xf32>
    %cst_15 = arith.constant dense<0.000000e+00> : vector<4x12xf32>
    %18 = vector.multi_reduction <add>, %17, %cst_15 [2] : vector<4x12x12xf32> to vector<4x12xf32>
    %19 = vector.shape_cast %18 : vector<4x12xf32> to vector<4x12x1xf32>
    %20 = tpu.reciprocal %19 {approx = true} : vector<4x12x1xf32> -> vector<4x12x1xf32>
    %21 = vector.broadcast %20 : vector<4x12x1xf32> to vector<4x12x12xf32>
    %22 = arith.mulf %17, %21 : vector<4x12x12xf32>
    %23 = arith.truncf %22 : vector<4x12x12xf32> to vector<4x12x12xbf16>
    "tpu.trace_start"() <{level = 10 : i32, message = "hqk,hkd->hqd"}> : () -> ()
    %cst_16 = arith.constant dense<0.000000e+00> : vector<4x12x8xf32>
    %24 = tpu.matmul %23, %5, %cst_16 {dimension_numbers = #tpu.dot_dimension_numbers<[2], [1], [1], [2], [0, 0, 0, 1, 1, 2], [0], [0]>} : vector<4x12x12xbf16>, vector<4x12x8xbf16>, vector<4x12x8xf32> -> vector<4x12x8xf32>
    "tpu.trace_stop"() : () -> ()
    %25 = arith.truncf %24 : vector<4x12x8xf32> to vector<4x12x8xbf16>
    %c0_17 = arith.constant 0 : index
    %c0_18 = arith.constant 0 : index
    %c0_19 = arith.constant 0 : index
    %c0_20 = arith.constant 0 : index
    %26 = vector.load %arg6[%c0_17, %c0_18, %c0_19, %c0_20] : memref<1x4x12x8xbf16, #tpu.memory_space<vmem>>, vector<1x4x12x8xbf16>
    %27 = vector.shape_cast %26 : vector<1x4x12x8xbf16> to vector<4x12x8xbf16>
    %28 = vector.shape_cast %25 : vector<4x12x8xbf16> to vector<1x4x12x8xbf16>
    tpu.vector_store %arg6[%c0_17, %c0_18, %c0_19, %c0_20], %28 {strides = array<i32>} : memref<1x4x12x8xbf16, #tpu.memory_space<vmem>>, vector<1x4x12x8xbf16>,
    return
  }
  func.func @transform_0(%arg0: i32, %arg1: i32) -> (i32, i32, i32, i32) {
    %c0_i32 = arith.constant 0 : i32
    %c0_i32_0 = arith.constant 0 : i32
    %c0_i32_1 = arith.constant 0 : i32
    return %arg0, %arg1, %c0_i32, %c0_i32_0 : i32, i32, i32, i32
  }
  func.func @transform_1(%arg0: i32, %arg1: i32) -> (i32, i32, i32, i32) {
    %c0_i32 = arith.constant 0 : i32
    %c0_i32_0 = arith.constant 0 : i32
    %c0_i32_1 = arith.constant 0 : i32
    return %arg0, %arg1, %c0_i32, %c0_i32_0 : i32, i32, i32, i32
  }
  func.func @transform_2(%arg0: i32, %arg1: i32) -> (i32, i32, i32, i32) {
    %c0_i32 = arith.constant 0 : i32
    %c0_i32_0 = arith.constant 0 : i32
    %c0_i32_1 = arith.constant 0 : i32
    return %arg0, %arg1, %c0_i32, %c0_i32_0 : i32, i32, i32, i32
  }
  func.func @transform_3(%arg0: i32, %arg1: i32) -> (i32, i32) {
    %c0_i32 = arith.constant 0 : i32
    %c0_i32_0 = arith.constant 0 : i32
    %c0_i32_1 = arith.constant 0 : i32
    return %c0_i32, %c0_i32_0 : i32, i32
  }
  func.func @transform_4(%arg0: i32, %arg1: i32) -> (i32, i32, i32, i32) {
    %c0_i32 = arith.constant 0 : i32
    %c0_i32_0 = arith.constant 0 : i32
    %c0_i32_1 = arith.constant 0 : i32
    return %arg0, %arg1, %c0_i32, %c0_i32_0 : i32, i32, i32, i32
  }
}

module attributes {stable_mosaic.version = 11 : i64} {
  func.func @kernel(%arg0: i32, %arg1: i32, %arg2: i32, %arg3: memref<24x32xbf16, #tpu.memory_space<vmem>>, %arg4: memref<32x32xbf16, #tpu.memory_space<vmem>>, %arg5: memref<1x32xf32, #tpu.memory_space<vmem>>, %arg6: memref<24x32xf32, #tpu.memory_space<vmem>>, %arg7: memref<24x32xf32, #tpu.memory_space<vmem>>, %arg8: memref<24x32xf32, #tpu.memory_space<vmem>>) attributes {dimension_semantics = [#tpu.dimension_semantics<parallel>, #tpu.dimension_semantics<parallel>, #tpu.dimension_semantics<arbitrary>], iteration_bounds = array<i64: 1, 1, 1>, scalar_prefetch = 0 : i64, scratch_operands = 1 : i64, tpu.core_type = #tpu.core_type<tc>, window_params = [{transform_indices = @transform_0, window_bounds = array<i64: 24, 32>}, {transform_indices = @transform_1, window_bounds = array<i64: 32, 32>}, {transform_indices = @transform_2, window_bounds = array<i64: 1, 32>}, {transform_indices = @transform_3, window_bounds = array<i64: 24, 32>}, {transform_indices = @transform_4, window_bounds = array<i64: 24, 32>}]} {
    %c0_i32 = arith.constant 0 : i32
    %0 = arith.cmpi eq, %arg2, %c0_i32 : i32
    %1 = arith.extui %0 : i1 to i32
    %c0_i32_0 = arith.constant 0 : i32
    %2 = arith.cmpi ne, %1, %c0_i32_0 : i32
    scf.if %2 {
      %cst_10 = arith.constant 0.000000e+00 : f32
      %12 = vector.broadcast %cst_10 : f32 to vector<24x32xf32>
      %c0_11 = arith.constant 0 : index
      %c0_12 = arith.constant 0 : index
      %13 = vector.load %arg8[%c0_11, %c0_12] : memref<24x32xf32, #tpu.memory_space<vmem>>, vector<24x32xf32>
      tpu.vector_store %arg8[%c0_11, %c0_12], %12 {strides = array<i32>} : memref<24x32xf32, #tpu.memory_space<vmem>>, vector<24x32xf32>,
    } else {
    }
    %c0 = arith.constant 0 : index
    %c0_1 = arith.constant 0 : index
    %3 = vector.load %arg3[%c0, %c0_1] : memref<24x32xbf16, #tpu.memory_space<vmem>>, vector<24x32xbf16>
    %c0_2 = arith.constant 0 : index
    %c0_3 = arith.constant 0 : index
    %4 = vector.load %arg4[%c0_2, %c0_3] : memref<32x32xbf16, #tpu.memory_space<vmem>>, vector<32x32xbf16>
    %cst = arith.constant dense<0.000000e+00> : vector<24x32xf32>
    %5 = tpu.matmul %3, %4, %cst {dimension_numbers = #tpu.dot_dimension_numbers<[1], [0], [0], [1], [0, 0, 1, 1], [], []>} : vector<24x32xbf16>, vector<32x32xbf16>, vector<24x32xf32> -> vector<24x32xf32>
    %c0_4 = arith.constant 0 : index
    %c0_5 = arith.constant 0 : index
    %6 = vector.load %arg8[%c0_4, %c0_5] : memref<24x32xf32, #tpu.memory_space<vmem>>, vector<24x32xf32>
    %7 = arith.addf %6, %5 : vector<24x32xf32>
    %c0_6 = arith.constant 0 : index
    %c0_7 = arith.constant 0 : index
    %8 = vector.load %arg8[%c0_6, %c0_7] : memref<24x32xf32, #tpu.memory_space<vmem>>, vector<24x32xf32>
    tpu.vector_store %arg8[%c0_6, %c0_7], %7 {strides = array<i32>} : memref<24x32xf32, #tpu.memory_space<vmem>>, vector<24x32xf32>,
    %c0_i32_8 = arith.constant 0 : i32
    %9 = arith.cmpi eq, %arg2, %c0_i32_8 : i32
    %10 = arith.extui %9 : i1 to i32
    %c0_i32_9 = arith.constant 0 : i32
    %11 = arith.cmpi ne, %10, %c0_i32_9 : i32
    scf.if %11 {
      %c0_10 = arith.constant 0 : index
      %c0_11 = arith.constant 0 : index
      %12 = vector.load %arg8[%c0_10, %c0_11] : memref<24x32xf32, #tpu.memory_space<vmem>>, vector<24x32xf32>
      %c0_12 = arith.constant 0 : index
      %c0_13 = arith.constant 0 : index
      %13 = vector.load %arg5[%c0_12, %c0_13] : memref<1x32xf32, #tpu.memory_space<vmem>>, vector<1x32xf32>
      %14 = vector.broadcast %13 : vector<1x32xf32> to vector<24x32xf32>
      %15 = arith.addf %12, %14 : vector<24x32xf32>
      %c0_14 = arith.constant 0 : index
      %c0_15 = arith.constant 0 : index
      %16 = vector.load %arg6[%c0_14, %c0_15] : memref<24x32xf32, #tpu.memory_space<vmem>>, vector<24x32xf32>
      %17 = arith.addf %15, %16 : vector<24x32xf32>
      %c0_16 = arith.constant 0 : index
      %c0_17 = arith.constant 0 : index
      %18 = vector.load %arg7[%c0_16, %c0_17] : memref<24x32xf32, #tpu.memory_space<vmem>>, vector<24x32xf32>
      tpu.vector_store %arg7[%c0_16, %c0_17], %17 {strides = array<i32>} : memref<24x32xf32, #tpu.memory_space<vmem>>, vector<24x32xf32>,
    } else {
    }
    return
  }
  func.func @transform_0(%arg0: i32, %arg1: i32, %arg2: i32) -> (i32, i32) {
    %c0_i32 = arith.constant 0 : i32
    return %arg0, %arg2 : i32, i32
  }
  func.func @transform_1(%arg0: i32, %arg1: i32, %arg2: i32) -> (i32, i32) {
    %c0_i32 = arith.constant 0 : i32
    return %arg2, %arg1 : i32, i32
  }
  func.func @transform_2(%arg0: i32, %arg1: i32, %arg2: i32) -> (i32, i32) {
    %c0_i32 = arith.constant 0 : i32
    %c0_i32_0 = arith.constant 0 : i32
    return %c0_i32, %arg1 : i32, i32
  }
  func.func @transform_3(%arg0: i32, %arg1: i32, %arg2: i32) -> (i32, i32) {
    %c0_i32 = arith.constant 0 : i32
    return %arg0, %arg1 : i32, i32
  }
  func.func @transform_4(%arg0: i32, %arg1: i32, %arg2: i32) -> (i32, i32) {
    %c0_i32 = arith.constant 0 : i32
    return %arg0, %arg1 : i32, i32
  }
}

module attributes {stable_mosaic.version = 11 : i64} {
  func.func @kernel(%arg0: i32, %arg1: i32, %arg2: i32, %arg3: memref<32x32xbf16, #tpu.memory_space<vmem>>, %arg4: memref<32x32xbf16, #tpu.memory_space<vmem>>, %arg5: memref<1x32xf32, #tpu.memory_space<vmem>>, %arg6: memref<32x32xbf16, #tpu.memory_space<vmem>>, %arg7: memref<32x32xf32, #tpu.memory_space<vmem>>) attributes {dimension_semantics = [#tpu.dimension_semantics<parallel>, #tpu.dimension_semantics<parallel>, #tpu.dimension_semantics<arbitrary>], iteration_bounds = array<i64: 1, 1, 1>, scalar_prefetch = 0 : i64, scratch_operands = 1 : i64, tpu.core_type = #tpu.core_type<tc>, window_params = [{transform_indices = @transform_0, window_bounds = array<i64: 32, 32>}, {transform_indices = @transform_1, window_bounds = array<i64: 32, 32>}, {transform_indices = @transform_2, window_bounds = array<i64: 1, 32>}, {transform_indices = @transform_3, window_bounds = array<i64: 32, 32>}]} {
    %c0_i32 = arith.constant 0 : i32
    %0 = arith.cmpi eq, %arg2, %c0_i32 : i32
    %1 = arith.extui %0 : i1 to i32
    %c0_i32_0 = arith.constant 0 : i32
    %2 = arith.cmpi ne, %1, %c0_i32_0 : i32
    scf.if %2 {
      %cst_10 = arith.constant 0.000000e+00 : f32
      %12 = vector.broadcast %cst_10 : f32 to vector<32x32xf32>
      %c0_11 = arith.constant 0 : index
      %c0_12 = arith.constant 0 : index
      %13 = vector.load %arg7[%c0_11, %c0_12] : memref<32x32xf32, #tpu.memory_space<vmem>>, vector<32x32xf32>
      tpu.vector_store %arg7[%c0_11, %c0_12], %12 {strides = array<i32>} : memref<32x32xf32, #tpu.memory_space<vmem>>, vector<32x32xf32>,
    } else {
    }
    %c0 = arith.constant 0 : index
    %c0_1 = arith.constant 0 : index
    %3 = vector.load %arg3[%c0, %c0_1] : memref<32x32xbf16, #tpu.memory_space<vmem>>, vector<32x32xbf16>
    %c0_2 = arith.constant 0 : index
    %c0_3 = arith.constant 0 : index
    %4 = vector.load %arg4[%c0_2, %c0_3] : memref<32x32xbf16, #tpu.memory_space<vmem>>, vector<32x32xbf16>
    %cst = arith.constant dense<0.000000e+00> : vector<32x32xf32>
    %5 = tpu.matmul %3, %4, %cst {dimension_numbers = #tpu.dot_dimension_numbers<[1], [0], [0], [1], [0, 0, 1, 1], [], []>} : vector<32x32xbf16>, vector<32x32xbf16>, vector<32x32xf32> -> vector<32x32xf32>
    %c0_4 = arith.constant 0 : index
    %c0_5 = arith.constant 0 : index
    %6 = vector.load %arg7[%c0_4, %c0_5] : memref<32x32xf32, #tpu.memory_space<vmem>>, vector<32x32xf32>
    %7 = arith.addf %6, %5 : vector<32x32xf32>
    %c0_6 = arith.constant 0 : index
    %c0_7 = arith.constant 0 : index
    %8 = vector.load %arg7[%c0_6, %c0_7] : memref<32x32xf32, #tpu.memory_space<vmem>>, vector<32x32xf32>
    tpu.vector_store %arg7[%c0_6, %c0_7], %7 {strides = array<i32>} : memref<32x32xf32, #tpu.memory_space<vmem>>, vector<32x32xf32>,
    %c0_i32_8 = arith.constant 0 : i32
    %9 = arith.cmpi eq, %arg2, %c0_i32_8 : i32
    %10 = arith.extui %9 : i1 to i32
    %c0_i32_9 = arith.constant 0 : i32
    %11 = arith.cmpi ne, %10, %c0_i32_9 : i32
    scf.if %11 {
      %c0_10 = arith.constant 0 : index
      %c0_11 = arith.constant 0 : index
      %12 = vector.load %arg7[%c0_10, %c0_11] : memref<32x32xf32, #tpu.memory_space<vmem>>, vector<32x32xf32>
      %c0_12 = arith.constant 0 : index
      %c0_13 = arith.constant 0 : index
      %13 = vector.load %arg5[%c0_12, %c0_13] : memref<1x32xf32, #tpu.memory_space<vmem>>, vector<1x32xf32>
      %14 = vector.broadcast %13 : vector<1x32xf32> to vector<32x32xf32>
      %15 = arith.addf %12, %14 : vector<32x32xf32>
      %16 = arith.truncf %15 : vector<32x32xf32> to vector<32x32xbf16>
      %c0_14 = arith.constant 0 : index
      %c0_15 = arith.constant 0 : index
      %17 = vector.load %arg6[%c0_14, %c0_15] : memref<32x32xbf16, #tpu.memory_space<vmem>>, vector<32x32xbf16>
      tpu.vector_store %arg6[%c0_14, %c0_15], %16 {strides = array<i32>} : memref<32x32xbf16, #tpu.memory_space<vmem>>, vector<32x32xbf16>,
    } else {
    }
    return
  }
  func.func @transform_0(%arg0: i32, %arg1: i32, %arg2: i32) -> (i32, i32) {
    %c0_i32 = arith.constant 0 : i32
    return %arg0, %arg2 : i32, i32
  }
  func.func @transform_1(%arg0: i32, %arg1: i32, %arg2: i32) -> (i32, i32) {
    %c0_i32 = arith.constant 0 : i32
    return %arg2, %arg1 : i32, i32
  }
  func.func @transform_2(%arg0: i32, %arg1: i32, %arg2: i32) -> (i32, i32) {
    %c0_i32 = arith.constant 0 : i32
    %c0_i32_0 = arith.constant 0 : i32
    return %c0_i32, %arg1 : i32, i32
  }
  func.func @transform_3(%arg0: i32, %arg1: i32, %arg2: i32) -> (i32, i32) {
    %c0_i32 = arith.constant 0 : i32
    return %arg0, %arg1 : i32, i32
  }
}

module attributes {stable_mosaic.version = 11 : i64} {
  func.func @kernel(%arg0: i32, %arg1: i32, %arg2: i32, %arg3: memref<32x32xbf16, #tpu.memory_space<vmem>>, %arg4: memref<32x32xbf16, #tpu.memory_space<vmem>>, %arg5: memref<32x32xbf16, #tpu.memory_space<vmem>>, %arg6: memref<32x32xf32, #tpu.memory_space<vmem>>) attributes {dimension_semantics = [#tpu.dimension_semantics<parallel>, #tpu.dimension_semantics<parallel>, #tpu.dimension_semantics<arbitrary>], iteration_bounds = array<i64: 1, 1, 1>, scalar_prefetch = 0 : i64, scratch_operands = 1 : i64, tpu.core_type = #tpu.core_type<tc>, window_params = [{transform_indices = @transform_0, window_bounds = array<i64: 32, 32>}, {transform_indices = @transform_1, window_bounds = array<i64: 32, 32>}, {transform_indices = @transform_2, window_bounds = array<i64: 32, 32>}]} {
    %c0_i32 = arith.constant 0 : i32
    %0 = arith.cmpi eq, %arg2, %c0_i32 : i32
    %1 = arith.extui %0 : i1 to i32
    %c0_i32_0 = arith.constant 0 : i32
    %2 = arith.cmpi ne, %1, %c0_i32_0 : i32
    scf.if %2 {
      %cst_10 = arith.constant 0.000000e+00 : f32
      %12 = vector.broadcast %cst_10 : f32 to vector<32x32xf32>
      %c0_11 = arith.constant 0 : index
      %c0_12 = arith.constant 0 : index
      %13 = vector.load %arg6[%c0_11, %c0_12] : memref<32x32xf32, #tpu.memory_space<vmem>>, vector<32x32xf32>
      tpu.vector_store %arg6[%c0_11, %c0_12], %12 {strides = array<i32>} : memref<32x32xf32, #tpu.memory_space<vmem>>, vector<32x32xf32>,
    } else {
    }
    %c0 = arith.constant 0 : index
    %c0_1 = arith.constant 0 : index
    %3 = vector.load %arg3[%c0, %c0_1] : memref<32x32xbf16, #tpu.memory_space<vmem>>, vector<32x32xbf16>
    %c0_2 = arith.constant 0 : index
    %c0_3 = arith.constant 0 : index
    %4 = vector.load %arg4[%c0_2, %c0_3] : memref<32x32xbf16, #tpu.memory_space<vmem>>, vector<32x32xbf16>
    %cst = arith.constant dense<0.000000e+00> : vector<32x32xf32>
    %5 = tpu.matmul %3, %4, %cst {dimension_numbers = #tpu.dot_dimension_numbers<[1], [0], [0], [1], [0, 0, 1, 1], [], []>} : vector<32x32xbf16>, vector<32x32xbf16>, vector<32x32xf32> -> vector<32x32xf32>
    %c0_4 = arith.constant 0 : index
    %c0_5 = arith.constant 0 : index
    %6 = vector.load %arg6[%c0_4, %c0_5] : memref<32x32xf32, #tpu.memory_space<vmem>>, vector<32x32xf32>
    %7 = arith.addf %6, %5 : vector<32x32xf32>
    %c0_6 = arith.constant 0 : index
    %c0_7 = arith.constant 0 : index
    %8 = vector.load %arg6[%c0_6, %c0_7] : memref<32x32xf32, #tpu.memory_space<vmem>>, vector<32x32xf32>
    tpu.vector_store %arg6[%c0_6, %c0_7], %7 {strides = array<i32>} : memref<32x32xf32, #tpu.memory_space<vmem>>, vector<32x32xf32>,
    %c0_i32_8 = arith.constant 0 : i32
    %9 = arith.cmpi eq, %arg2, %c0_i32_8 : i32
    %10 = arith.extui %9 : i1 to i32
    %c0_i32_9 = arith.constant 0 : i32
    %11 = arith.cmpi ne, %10, %c0_i32_9 : i32
    scf.if %11 {
      %c0_10 = arith.constant 0 : index
      %c0_11 = arith.constant 0 : index
      %12 = vector.load %arg6[%c0_10, %c0_11] : memref<32x32xf32, #tpu.memory_space<vmem>>, vector<32x32xf32>
      %13 = arith.truncf %12 : vector<32x32xf32> to vector<32x32xbf16>
      %c0_12 = arith.constant 0 : index
      %c0_13 = arith.constant 0 : index
      %14 = vector.load %arg5[%c0_12, %c0_13] : memref<32x32xbf16, #tpu.memory_space<vmem>>, vector<32x32xbf16>
      tpu.vector_store %arg5[%c0_12, %c0_13], %13 {strides = array<i32>} : memref<32x32xbf16, #tpu.memory_space<vmem>>, vector<32x32xbf16>,
    } else {
    }
    return
  }
  func.func @transform_0(%arg0: i32, %arg1: i32, %arg2: i32) -> (i32, i32) {
    %c0_i32 = arith.constant 0 : i32
    return %arg0, %arg2 : i32, i32
  }
  func.func @transform_1(%arg0: i32, %arg1: i32, %arg2: i32) -> (i32, i32) {
    %c0_i32 = arith.constant 0 : i32
    return %arg2, %arg1 : i32, i32
  }
  func.func @transform_2(%arg0: i32, %arg1: i32, %arg2: i32) -> (i32, i32) {
    %c0_i32 = arith.constant 0 : i32
    return %arg0, %arg1 : i32, i32
  }
}

module attributes {stable_mosaic.version = 11 : i64} {
  func.func @kernel(%arg0: i32, %arg1: i32, %arg2: memref<1x4x12x8xbf16, #tpu.memory_space<vmem>>, %arg3: memref<1x4x16x8xbf16, #tpu.memory_space<vmem>>, %arg4: memref<1x4x16x8xbf16, #tpu.memory_space<vmem>>, %arg5: memref<1x4x12x8xbf16, #tpu.memory_space<vmem>>) attributes {dimension_semantics = [#tpu.dimension_semantics<parallel>, #tpu.dimension_semantics<parallel>], iteration_bounds = array<i64: 2, 1>, scalar_prefetch = 0 : i64, scratch_operands = 0 : i64, tpu.core_type = #tpu.core_type<tc>, window_params = [{transform_indices = @transform_0, window_bounds = array<i64: 1, 4, 12, 8>}, {transform_indices = @transform_1, window_bounds = array<i64: 1, 4, 16, 8>}, {transform_indices = @transform_2, window_bounds = array<i64: 1, 4, 16, 8>}, {transform_indices = @transform_3, window_bounds = array<i64: 1, 4, 12, 8>}]} {
    %c0 = arith.constant 0 : index
    %c0_0 = arith.constant 0 : index
    %c0_1 = arith.constant 0 : index
    %c0_2 = arith.constant 0 : index
    %0 = vector.load %arg2[%c0, %c0_0, %c0_1, %c0_2] : memref<1x4x12x8xbf16, #tpu.memory_space<vmem>>, vector<1x4x12x8xbf16>
    %1 = vector.shape_cast %0 : vector<1x4x12x8xbf16> to vector<4x12x8xbf16>
    %c0_3 = arith.constant 0 : index
    %c0_4 = arith.constant 0 : index
    %c0_5 = arith.constant 0 : index
    %c0_6 = arith.constant 0 : index
    %2 = vector.load %arg3[%c0_3, %c0_4, %c0_5, %c0_6] : memref<1x4x16x8xbf16, #tpu.memory_space<vmem>>, vector<1x4x16x8xbf16>
    %3 = vector.shape_cast %2 : vector<1x4x16x8xbf16> to vector<4x16x8xbf16>
    %c0_7 = arith.constant 0 : index
    %c0_8 = arith.constant 0 : index
    %c0_9 = arith.constant 0 : index
    %c0_10 = arith.constant 0 : index
    %4 = vector.load %arg4[%c0_7, %c0_8, %c0_9, %c0_10] : memref<1x4x16x8xbf16, #tpu.memory_space<vmem>>, vector<1x4x16x8xbf16>
    %5 = vector.shape_cast %4 : vector<1x4x16x8xbf16> to vector<4x16x8xbf16>
    "tpu.trace_start"() <{level = 10 : i32, message = "hqd,hkd->hqk"}> : () -> ()
    %cst = arith.constant dense<0.000000e+00> : vector<4x12x16xf32>
    %6 = tpu.matmul %1, %3, %cst {dimension_numbers = #tpu.dot_dimension_numbers<[2], [2], [1], [1], [0, 0, 0, 1, 1, 1], [0], [0]>} : vector<4x12x8xbf16>, vector<4x16x8xbf16>, vector<4x12x16xf32> -> vector<4x12x16xf32>
    "tpu.trace_stop"() : () -> ()
    %cst_11 = arith.constant 0.353553385 : f32
    %7 = vector.broadcast %cst_11 : f32 to vector<4x12x16xf32>
    %8 = arith.mulf %6, %7 : vector<4x12x16xf32>
    %cst_12 = arith.constant dense<0xFF800000> : vector<4x12xf32>
    %9 = vector.multi_reduction <maximumf>, %8, %cst_12 [2] : vector<4x12x16xf32> to vector<4x12xf32>
    %10 = vector.shape_cast %9 : vector<4x12xf32> to vector<4x12x1xf32>
    %11 = vector.broadcast %10 : vector<4x12x1xf32> to vector<4x12x16xf32>
    %12 = arith.subf %8, %11 : vector<4x12x16xf32>
    %13 = math.exp %12 : vector<4x12x16xf32>
    %cst_13 = arith.constant dense<0.000000e+00> : vector<4x12xf32>
    %14 = vector.multi_reduction <add>, %13, %cst_13 [2] : vector<4x12x16xf32> to vector<4x12xf32>
    %15 = vector.shape_cast %14 : vector<4x12xf32> to vector<4x12x1xf32>
    %16 = tpu.reciprocal %15 {approx = true} : vector<4x12x1xf32> -> vector<4x12x1xf32>
    %17 = vector.broadcast %16 : vector<4x12x1xf32> to vector<4x12x16xf32>
    %18 = arith.mulf %13, %17 : vector<4x12x16xf32>
    %19 = arith.truncf %18 : vector<4x12x16xf32> to vector<4x12x16xbf16>
    "tpu.trace_start"() <{level = 10 : i32, message = "hqk,hkd->hqd"}> : () -> ()
    %cst_14 = arith.constant dense<0.000000e+00> : vector<4x12x8xf32>
    %20 = tpu.matmul %19, %5, %cst_14 {dimension_numbers = #tpu.dot_dimension_numbers<[2], [1], [1], [2], [0, 0, 0, 1, 1, 2], [0], [0]>} : vector<4x12x16xbf16>, vector<4x16x8xbf16>, vector<4x12x8xf32> -> vector<4x12x8xf32>
    "tpu.trace_stop"() : () -> ()
    %21 = arith.truncf %20 : vector<4x12x8xf32> to vector<4x12x8xbf16>
    %c0_15 = arith.constant 0 : index
    %c0_16 = arith.constant 0 : index
    %c0_17 = arith.constant 0 : index
    %c0_18 = arith.constant 0 : index
    %22 = vector.load %arg5[%c0_15, %c0_16, %c0_17, %c0_18] : memref<1x4x12x8xbf16, #tpu.memory_space<vmem>>, vector<1x4x12x8xbf16>
    %23 = vector.shape_cast %22 : vector<1x4x12x8xbf16> to vector<4x12x8xbf16>
    %24 = vector.shape_cast %21 : vector<4x12x8xbf16> to vector<1x4x12x8xbf16>
    tpu.vector_store %arg5[%c0_15, %c0_16, %c0_17, %c0_18], %24 {strides = array<i32>} : memref<1x4x12x8xbf16, #tpu.memory_space<vmem>>, vector<1x4x12x8xbf16>,
    return
  }
  func.func @transform_0(%arg0: i32, %arg1: i32) -> (i32, i32, i32, i32) {
    %c0_i32 = arith.constant 0 : i32
    %c0_i32_0 = arith.constant 0 : i32
    %c0_i32_1 = arith.constant 0 : i32
    return %arg0, %arg1, %c0_i32, %c0_i32_0 : i32, i32, i32, i32
  }
  func.func @transform_1(%arg0: i32, %arg1: i32) -> (i32, i32, i32, i32) {
    %c0_i32 = arith.constant 0 : i32
    %c0_i32_0 = arith.constant 0 : i32
    %c0_i32_1 = arith.constant 0 : i32
    return %arg0, %arg1, %c0_i32, %c0_i32_0 : i32, i32, i32, i32
  }
  func.func @transform_2(%arg0: i32, %arg1: i32) -> (i32, i32, i32, i32) {
    %c0_i32 = arith.constant 0 : i32
    %c0_i32_0 = arith.constant 0 : i32
    %c0_i32_1 = arith.constant 0 : i32
    return %arg0, %arg1, %c0_i32, %c0_i32_0 : i32, i32, i32, i32
  }
  func.func @transform_3(%arg0: i32, %arg1: i32) -> (i32, i32, i32, i32) {
    %c0_i32 = arith.constant 0 : i32
    %c0_i32_0 = arith.constant 0 : i32
    %c0_i32_1 = arith.constant 0 : i32
    return %arg0, %arg1, %c0_i32, %c0_i32_0 : i32, i32, i32, i32
  }
}

module attributes {stable_mosaic.version = 11 : i64} {
  func.func @kernel(%arg0: i32, %arg1: i32, %arg2: i32, %arg3: memref<24x32xbf16, #tpu.memory_space<vmem>>, %arg4: memref<32x128xbf16, #tpu.memory_space<vmem>>, %arg5: memref<1x128xf32, #tpu.memory_space<vmem>>, %arg6: memref<24x128xbf16, #tpu.memory_space<vmem>>, %arg7: memref<24x128xf32, #tpu.memory_space<vmem>>) attributes {dimension_semantics = [#tpu.dimension_semantics<parallel>, #tpu.dimension_semantics<parallel>, #tpu.dimension_semantics<arbitrary>], iteration_bounds = array<i64: 1, 1, 1>, scalar_prefetch = 0 : i64, scratch_operands = 1 : i64, tpu.core_type = #tpu.core_type<tc>, window_params = [{transform_indices = @transform_0, window_bounds = array<i64: 24, 32>}, {transform_indices = @transform_1, window_bounds = array<i64: 32, 128>}, {transform_indices = @transform_2, window_bounds = array<i64: 1, 128>}, {transform_indices = @transform_3, window_bounds = array<i64: 24, 128>}]} {
    %c0_i32 = arith.constant 0 : i32
    %0 = arith.cmpi eq, %arg2, %c0_i32 : i32
    %1 = arith.extui %0 : i1 to i32
    %c0_i32_0 = arith.constant 0 : i32
    %2 = arith.cmpi ne, %1, %c0_i32_0 : i32
    scf.if %2 {
      %cst_10 = arith.constant 0.000000e+00 : f32
      %12 = vector.broadcast %cst_10 : f32 to vector<24x128xf32>
      %c0_11 = arith.constant 0 : index
      %c0_12 = arith.constant 0 : index
      %13 = vector.load %arg7[%c0_11, %c0_12] : memref<24x128xf32, #tpu.memory_space<vmem>>, vector<24x128xf32>
      tpu.vector_store %arg7[%c0_11, %c0_12], %12 {strides = array<i32>} : memref<24x128xf32, #tpu.memory_space<vmem>>, vector<24x128xf32>,
    } else {
    }
    %c0 = arith.constant 0 : index
    %c0_1 = arith.constant 0 : index
    %3 = vector.load %arg3[%c0, %c0_1] : memref<24x32xbf16, #tpu.memory_space<vmem>>, vector<24x32xbf16>
    %c0_2 = arith.constant 0 : index
    %c0_3 = arith.constant 0 : index
    %4 = vector.load %arg4[%c0_2, %c0_3] : memref<32x128xbf16, #tpu.memory_space<vmem>>, vector<32x128xbf16>
    %cst = arith.constant dense<0.000000e+00> : vector<24x128xf32>
    %5 = tpu.matmul %3, %4, %cst {dimension_numbers = #tpu.dot_dimension_numbers<[1], [0], [0], [1], [0, 0, 1, 1], [], []>} : vector<24x32xbf16>, vector<32x128xbf16>, vector<24x128xf32> -> vector<24x128xf32>
    %c0_4 = arith.constant 0 : index
    %c0_5 = arith.constant 0 : index
    %6 = vector.load %arg7[%c0_4, %c0_5] : memref<24x128xf32, #tpu.memory_space<vmem>>, vector<24x128xf32>
    %7 = arith.addf %6, %5 : vector<24x128xf32>
    %c0_6 = arith.constant 0 : index
    %c0_7 = arith.constant 0 : index
    %8 = vector.load %arg7[%c0_6, %c0_7] : memref<24x128xf32, #tpu.memory_space<vmem>>, vector<24x128xf32>
    tpu.vector_store %arg7[%c0_6, %c0_7], %7 {strides = array<i32>} : memref<24x128xf32, #tpu.memory_space<vmem>>, vector<24x128xf32>,
    %c0_i32_8 = arith.constant 0 : i32
    %9 = arith.cmpi eq, %arg2, %c0_i32_8 : i32
    %10 = arith.extui %9 : i1 to i32
    %c0_i32_9 = arith.constant 0 : i32
    %11 = arith.cmpi ne, %10, %c0_i32_9 : i32
    scf.if %11 {
      %c0_10 = arith.constant 0 : index
      %c0_11 = arith.constant 0 : index
      %12 = vector.load %arg7[%c0_10, %c0_11] : memref<24x128xf32, #tpu.memory_space<vmem>>, vector<24x128xf32>
      %c0_12 = arith.constant 0 : index
      %c0_13 = arith.constant 0 : index
      %13 = vector.load %arg5[%c0_12, %c0_13] : memref<1x128xf32, #tpu.memory_space<vmem>>, vector<1x128xf32>
      %14 = vector.broadcast %13 : vector<1x128xf32> to vector<24x128xf32>
      %15 = arith.addf %12, %14 : vector<24x128xf32>
      %16 = arith.truncf %15 : vector<24x128xf32> to vector<24x128xbf16>
      %c0_14 = arith.constant 0 : index
      %c0_15 = arith.constant 0 : index
      %17 = vector.load %arg6[%c0_14, %c0_15] : memref<24x128xbf16, #tpu.memory_space<vmem>>, vector<24x128xbf16>
      tpu.vector_store %arg6[%c0_14, %c0_15], %16 {strides = array<i32>} : memref<24x128xbf16, #tpu.memory_space<vmem>>, vector<24x128xbf16>,
    } else {
    }
    return
  }
  func.func @transform_0(%arg0: i32, %arg1: i32, %arg2: i32) -> (i32, i32) {
    %c0_i32 = arith.constant 0 : i32
    return %arg0, %arg2 : i32, i32
  }
  func.func @transform_1(%arg0: i32, %arg1: i32, %arg2: i32) -> (i32, i32) {
    %c0_i32 = arith.constant 0 : i32
    return %arg2, %arg1 : i32, i32
  }
  func.func @transform_2(%arg0: i32, %arg1: i32, %arg2: i32) -> (i32, i32) {
    %c0_i32 = arith.constant 0 : i32
    %c0_i32_0 = arith.constant 0 : i32
    return %c0_i32, %arg1 : i32, i32
  }
  func.func @transform_3(%arg0: i32, %arg1: i32, %arg2: i32) -> (i32, i32) {
    %c0_i32 = arith.constant 0 : i32
    return %arg0, %arg1 : i32, i32
  }
}

module attributes {stable_mosaic.version = 11 : i64} {
  func.func @kernel(%arg0: i32, %arg1: i32, %arg2: i32, %arg3: memref<24x128xbf16, #tpu.memory_space<vmem>>, %arg4: memref<128x32xbf16, #tpu.memory_space<vmem>>, %arg5: memref<1x32xf32, #tpu.memory_space<vmem>>, %arg6: memref<24x32xf32, #tpu.memory_space<vmem>>, %arg7: memref<24x32xf32, #tpu.memory_space<vmem>>, %arg8: memref<24x32xf32, #tpu.memory_space<vmem>>) attributes {dimension_semantics = [#tpu.dimension_semantics<parallel>, #tpu.dimension_semantics<parallel>, #tpu.dimension_semantics<arbitrary>], iteration_bounds = array<i64: 1, 1, 1>, scalar_prefetch = 0 : i64, scratch_operands = 1 : i64, tpu.core_type = #tpu.core_type<tc>, window_params = [{transform_indices = @transform_0, window_bounds = array<i64: 24, 128>}, {transform_indices = @transform_1, window_bounds = array<i64: 128, 32>}, {transform_indices = @transform_2, window_bounds = array<i64: 1, 32>}, {transform_indices = @transform_3, window_bounds = array<i64: 24, 32>}, {transform_indices = @transform_4, window_bounds = array<i64: 24, 32>}]} {
    %c0_i32 = arith.constant 0 : i32
    %0 = arith.cmpi eq, %arg2, %c0_i32 : i32
    %1 = arith.extui %0 : i1 to i32
    %c0_i32_0 = arith.constant 0 : i32
    %2 = arith.cmpi ne, %1, %c0_i32_0 : i32
    scf.if %2 {
      %cst_10 = arith.constant 0.000000e+00 : f32
      %12 = vector.broadcast %cst_10 : f32 to vector<24x32xf32>
      %c0_11 = arith.constant 0 : index
      %c0_12 = arith.constant 0 : index
      %13 = vector.load %arg8[%c0_11, %c0_12] : memref<24x32xf32, #tpu.memory_space<vmem>>, vector<24x32xf32>
      tpu.vector_store %arg8[%c0_11, %c0_12], %12 {strides = array<i32>} : memref<24x32xf32, #tpu.memory_space<vmem>>, vector<24x32xf32>,
    } else {
    }
    %c0 = arith.constant 0 : index
    %c0_1 = arith.constant 0 : index
    %3 = vector.load %arg3[%c0, %c0_1] : memref<24x128xbf16, #tpu.memory_space<vmem>>, vector<24x128xbf16>
    %c0_2 = arith.constant 0 : index
    %c0_3 = arith.constant 0 : index
    %4 = vector.load %arg4[%c0_2, %c0_3] : memref<128x32xbf16, #tpu.memory_space<vmem>>, vector<128x32xbf16>
    %cst = arith.constant dense<0.000000e+00> : vector<24x32xf32>
    %5 = tpu.matmul %3, %4, %cst {dimension_numbers = #tpu.dot_dimension_numbers<[1], [0], [0], [1], [0, 0, 1, 1], [], []>} : vector<24x128xbf16>, vector<128x32xbf16>, vector<24x32xf32> -> vector<24x32xf32>
    %c0_4 = arith.constant 0 : index
    %c0_5 = arith.constant 0 : index
    %6 = vector.load %arg8[%c0_4, %c0_5] : memref<24x32xf32, #tpu.memory_space<vmem>>, vector<24x32xf32>
    %7 = arith.addf %6, %5 : vector<24x32xf32>
    %c0_6 = arith.constant 0 : index
    %c0_7 = arith.constant 0 : index
    %8 = vector.load %arg8[%c0_6, %c0_7] : memref<24x32xf32, #tpu.memory_space<vmem>>, vector<24x32xf32>
    tpu.vector_store %arg8[%c0_6, %c0_7], %7 {strides = array<i32>} : memref<24x32xf32, #tpu.memory_space<vmem>>, vector<24x32xf32>,
    %c0_i32_8 = arith.constant 0 : i32
    %9 = arith.cmpi eq, %arg2, %c0_i32_8 : i32
    %10 = arith.extui %9 : i1 to i32
    %c0_i32_9 = arith.constant 0 : i32
    %11 = arith.cmpi ne, %10, %c0_i32_9 : i32
    scf.if %11 {
      %c0_10 = arith.constant 0 : index
      %c0_11 = arith.constant 0 : index
      %12 = vector.load %arg8[%c0_10, %c0_11] : memref<24x32xf32, #tpu.memory_space<vmem>>, vector<24x32xf32>
      %c0_12 = arith.constant 0 : index
      %c0_13 = arith.constant 0 : index
      %13 = vector.load %arg5[%c0_12, %c0_13] : memref<1x32xf32, #tpu.memory_space<vmem>>, vector<1x32xf32>
      %14 = vector.broadcast %13 : vector<1x32xf32> to vector<24x32xf32>
      %15 = arith.addf %12, %14 : vector<24x32xf32>
      %c0_14 = arith.constant 0 : index
      %c0_15 = arith.constant 0 : index
      %16 = vector.load %arg6[%c0_14, %c0_15] : memref<24x32xf32, #tpu.memory_space<vmem>>, vector<24x32xf32>
      %17 = arith.addf %15, %16 : vector<24x32xf32>
      %c0_16 = arith.constant 0 : index
      %c0_17 = arith.constant 0 : index
      %18 = vector.load %arg7[%c0_16, %c0_17] : memref<24x32xf32, #tpu.memory_space<vmem>>, vector<24x32xf32>
      tpu.vector_store %arg7[%c0_16, %c0_17], %17 {strides = array<i32>} : memref<24x32xf32, #tpu.memory_space<vmem>>, vector<24x32xf32>,
    } else {
    }
    return
  }
  func.func @transform_0(%arg0: i32, %arg1: i32, %arg2: i32) -> (i32, i32) {
    %c0_i32 = arith.constant 0 : i32
    return %arg0, %arg2 : i32, i32
  }
  func.func @transform_1(%arg0: i32, %arg1: i32, %arg2: i32) -> (i32, i32) {
    %c0_i32 = arith.constant 0 : i32
    return %arg2, %arg1 : i32, i32
  }
  func.func @transform_2(%arg0: i32, %arg1: i32, %arg2: i32) -> (i32, i32) {
    %c0_i32 = arith.constant 0 : i32
    %c0_i32_0 = arith.constant 0 : i32
    return %c0_i32, %arg1 : i32, i32
  }
  func.func @transform_3(%arg0: i32, %arg1: i32, %arg2: i32) -> (i32, i32) {
    %c0_i32 = arith.constant 0 : i32
    return %arg0, %arg1 : i32, i32
  }
  func.func @transform_4(%arg0: i32, %arg1: i32, %arg2: i32) -> (i32, i32) {
    %c0_i32 = arith.constant 0 : i32
    return %arg0, %arg1 : i32, i32
  }
}

module attributes {stable_mosaic.version = 11 : i64} {
  func.func @kernel(%arg0: i32, %arg1: i32, %arg2: i32, %arg3: memref<24x32xbf16, #tpu.memory_space<vmem>>, %arg4: memref<96x32xbf16, #tpu.memory_space<vmem>>, %arg5: memref<24x96xf32, #tpu.memory_space<vmem>>, %arg6: memref<24x96xf32, #tpu.memory_space<vmem>>) attributes {dimension_semantics = [#tpu.dimension_semantics<parallel>, #tpu.dimension_semantics<parallel>, #tpu.dimension_semantics<arbitrary>], iteration_bounds = array<i64: 1, 1, 1>, scalar_prefetch = 0 : i64, scratch_operands = 1 : i64, tpu.core_type = #tpu.core_type<tc>, window_params = [{transform_indices = @transform_0, window_bounds = array<i64: 24, 32>}, {transform_indices = @transform_1, window_bounds = array<i64: 96, 32>}, {transform_indices = @transform_2, window_bounds = array<i64: 24, 96>}]} {
    %c0_i32 = arith.constant 0 : i32
    %0 = arith.cmpi eq, %arg2, %c0_i32 : i32
    %1 = arith.extui %0 : i1 to i32
    %c0_i32_0 = arith.constant 0 : i32
    %2 = arith.cmpi ne, %1, %c0_i32_0 : i32
    scf.if %2 {
      %cst_10 = arith.constant 0.000000e+00 : f32
      %12 = vector.broadcast %cst_10 : f32 to vector<24x96xf32>
      %c0_11 = arith.constant 0 : index
      %c0_12 = arith.constant 0 : index
      %13 = vector.load %arg6[%c0_11, %c0_12] : memref<24x96xf32, #tpu.memory_space<vmem>>, vector<24x96xf32>
      tpu.vector_store %arg6[%c0_11, %c0_12], %12 {strides = array<i32>} : memref<24x96xf32, #tpu.memory_space<vmem>>, vector<24x96xf32>,
    } else {
    }
    %c0 = arith.constant 0 : index
    %c0_1 = arith.constant 0 : index
    %3 = vector.load %arg3[%c0, %c0_1] : memref<24x32xbf16, #tpu.memory_space<vmem>>, vector<24x32xbf16>
    %c0_2 = arith.constant 0 : index
    %c0_3 = arith.constant 0 : index
    %4 = vector.load %arg4[%c0_2, %c0_3] : memref<96x32xbf16, #tpu.memory_space<vmem>>, vector<96x32xbf16>
    %cst = arith.constant dense<0.000000e+00> : vector<24x96xf32>
    %5 = tpu.matmul %3, %4, %cst {dimension_numbers = #tpu.dot_dimension_numbers<[1], [1], [0], [0], [0, 0, 1, 0], [], []>} : vector<24x32xbf16>, vector<96x32xbf16>, vector<24x96xf32> -> vector<24x96xf32>
    %c0_4 = arith.constant 0 : index
    %c0_5 = arith.constant 0 : index
    %6 = vector.load %arg6[%c0_4, %c0_5] : memref<24x96xf32, #tpu.memory_space<vmem>>, vector<24x96xf32>
    %7 = arith.addf %6, %5 : vector<24x96xf32>
    %c0_6 = arith.constant 0 : index
    %c0_7 = arith.constant 0 : index
    %8 = vector.load %arg6[%c0_6, %c0_7] : memref<24x96xf32, #tpu.memory_space<vmem>>, vector<24x96xf32>
    tpu.vector_store %arg6[%c0_6, %c0_7], %7 {strides = array<i32>} : memref<24x96xf32, #tpu.memory_space<vmem>>, vector<24x96xf32>,
    %c0_i32_8 = arith.constant 0 : i32
    %9 = arith.cmpi eq, %arg2, %c0_i32_8 : i32
    %10 = arith.extui %9 : i1 to i32
    %c0_i32_9 = arith.constant 0 : i32
    %11 = arith.cmpi ne, %10, %c0_i32_9 : i32
    scf.if %11 {
      %c0_10 = arith.constant 0 : index
      %c0_11 = arith.constant 0 : index
      %12 = vector.load %arg6[%c0_10, %c0_11] : memref<24x96xf32, #tpu.memory_space<vmem>>, vector<24x96xf32>
      %c0_12 = arith.constant 0 : index
      %c0_13 = arith.constant 0 : index
      %13 = vector.load %arg5[%c0_12, %c0_13] : memref<24x96xf32, #tpu.memory_space<vmem>>, vector<24x96xf32>
      tpu.vector_store %arg5[%c0_12, %c0_13], %12 {strides = array<i32>} : memref<24x96xf32, #tpu.memory_space<vmem>>, vector<24x96xf32>,
    } else {
    }
    return
  }
  func.func @transform_0(%arg0: i32, %arg1: i32, %arg2: i32) -> (i32, i32) {
    %c0_i32 = arith.constant 0 : i32
    return %arg0, %arg2 : i32, i32
  }
  func.func @transform_1(%arg0: i32, %arg1: i32, %arg2: i32) -> (i32, i32) {
    %c0_i32 = arith.constant 0 : i32
    return %arg1, %arg2 : i32, i32
  }
  func.func @transform_2(%arg0: i32, %arg1: i32, %arg2: i32) -> (i32, i32) {
    %c0_i32 = arith.constant 0 : i32
    return %arg0, %arg1 : i32, i32
  }
}

</mosaic_0001>

<bundles_post_ra>
// kernel: soft_text_decoder_v2_forward.35
= control target key start
LH: loop header
LB: loop body
LE: loop exit
PB: predicated region body
PF: predicated region fallthrough
CT: control target
= control target key end

     0   :  { %vm19_vm0 = vcmask 261120   ;;  %v129_v1 = vmov 0.0   ;;  %vm100_vm1 = vcmask 257024   ;;  %s182_s1 = inlined_call_operand.vmem [shape: bf16[32,32], index: 1, kind: input, shape index: {}]   ;;  %s183_s0 = inlined_call_operand.vmem [shape: bf16[24,32], index: 0, kind: input, shape index: {}]   ;;  %s184_s2 = inlined_call_operand.vmem [shape: f32[1,32], index: 2, kind: input, shape index: {}]   ;;  %s185_s3 = inlined_call_operand.vmem [shape: bf16[24,32], index: 3, kind: output, shape index: {}]  }
   0x1   :  { %v124_v0 = vld [vmem:[%s182_s1 + $0x8] sm:$0xff]  ;;  %20 = vst.msk [vmem:[#allocation2] sm:$0xff] %vm19_vm0, %v129_v1  ;;  %v123_v3 = vld [vmem:[%s182_s1] sm:$0xff] }
   0x2   :  { %v25_v2 = vld [vmem:[%s183_s0 + $0x8] sm:$0xf]  ;;  %21 = vst.msk [vmem:[#allocation2 + $0x8] sm:$0xff] %vm19_vm0, %v129_v1  ;;  %63 = vmatpush.bf16.msra.mxu0 %v124_v0  ;;  %125 = vmatpush.bf16.msra.mxu1 %v124_v0  ;;  %v122_v5 = vld [vmem:[%s183_s0] sm:$0xff] }
   0x3   :  { %v35_v4 = vunpack.c.l.b16 %v25_v2  ;;  %22 = vst.msk [vmem:[#allocation2 + $0x10] sm:$0xff] %vm19_vm0, %v129_v1  ;;  %v128_v14 = vld [vmem:[%s184_s2] ss:$0 sm:$0xff] }
   0x5   :  { %v37_v6 = vpack.c.b16 %v35_v4, %v35_v4 }
   0x6   :  { %64 = vmatpush.bf16.msra.mxu0 %v123_v3  ;;  %126 = vmatpush.bf16.msra.mxu1 %v123_v3 }
   0x8   :  { %v75_v7 = vld [vmem:[#allocation2] sm:$0xff] }
   0x9   :  { %120 = vmatmul.msk.bf16.vlgmr.msra.gmra.mxu0 %vm19_vm0, %v122_v5  ;;  %121 = vmatmul.msk.bf16.vlgmr.msra.gmra.mxu1 %vm19_vm0, %v37_v6  ;;  %v76_v13 = vld [vmem:[#allocation2 + $0x8] sm:$0xff] }
   0xa   :  { %v77_v8 = vld [vmem:[#allocation2 + $0x10] sm:$0xff] }
  0x86   :  { %v66_v9 = vpop.f32.mrf.mxu0  ;;  %v71_v10 = vpop.f32.mrf.mxu1 }
  0x87   :  { %v78_v11 = vadd.f32 %v75_v7, %v66_v9  ;;  %v80_v12 = vadd.f32 %v77_v8, %v71_v10 }
  0x89   :  { %81 = vst.msk [vmem:[#allocation2] sm:$0xff] %vm19_vm0, %v78_v11 }
  0x8a   :  { %83 = vst.msk [vmem:[#allocation2 + $0x10] sm:$0xff] %vm19_vm0, %v80_v12 }
  0x8e   :  { %v68_v15 = vpop.f32.mrf.mxu0  ;;  %v73_v16 = vpop.f32.mrf.mxu1 }
  0x8f   :  { %v79_v17 = vadd.f32 %v76_v13, %v68_v15 }
  0x90   :  { %v87_v18 = vld [vmem:[#allocation2] sm:$0xff] }
  0x91   :  { %v94_v19 = vadd.f32 %v128_v14, %v87_v18  ;;  %v89_v20 = vld [vmem:[#allocation2 + $0x10] sm:$0xff]  ;;  %82 = vst.msk [vmem:[#allocation2 + $0x8] sm:$0xff] %vm19_vm0, %v79_v17 }
  0x92   :  { %v96_v21 = vadd.f32 %v128_v14, %v89_v20 }
  0x93   :  { %v97_v22 = vpack.c.bf16 %v94_v19, %v94_v19 }
  0x94   :  { %v99_v23 = vpack.c.bf16 %v96_v21, %v96_v21 }
  0x95   :  { %101 = vst.msk [vmem:[%s185_s3] sm:$0xf] %vm100_vm1, %v97_v22 }
  0x96   :  { %103 = vst.msk [vmem:[%s185_s3 + $0x8] sm:$0xf] %vm100_vm1, %v99_v23 }
  0x98   :  { %v88_v24 = vld [vmem:[#allocation2 + $0x8] sm:$0xff] }
  0x99   :  { %v95_v25 = vadd.f32 %v128_v14, %v88_v24 }
  0x9b   :  { %v98_v26 = vpack.c.bf16 %v95_v25, %v95_v25 }
  0x9d   :  { %102 = vst.msk [vmem:[%s185_s3 + $0x4] sm:$0xf] %vm100_vm1, %v98_v26 }

// kernel: soft_text_decoder_v2_forward.34
= control target key start
LH: loop header
LB: loop body
LE: loop exit
PB: predicated region body
PF: predicated region fallthrough
CT: control target
= control target key end

     0   :  { %vm16_vm0 = vcmask 261120   ;;  %v118_v1 = vmov 0.0   ;;  %vm90_vm1 = vcmask 257024   ;;  %s163_s1 = inlined_call_operand.vmem [shape: bf16[32,32], index: 1, kind: input, shape index: {}]   ;;  %s164_s0 = inlined_call_operand.vmem [shape: bf16[24,32], index: 0, kind: input, shape index: {}]   ;;  %s165_s2 = inlined_call_operand.vmem [shape: bf16[24,32], index: 2, kind: output, shape index: {}]  }
   0x1   :  { %v114_v0 = vld [vmem:[%s163_s1 + $0x8] sm:$0xff]  ;;  %17 = vst.msk [vmem:[#allocation2] sm:$0xff] %vm16_vm0, %v118_v1  ;;  %v113_v3 = vld [vmem:[%s163_s1] sm:$0xff] }
   0x2   :  { %v22_v2 = vld [vmem:[%s164_s0 + $0x8] sm:$0xf]  ;;  %18 = vst.msk [vmem:[#allocation2 + $0x8] sm:$0xff] %vm16_vm0, %v118_v1  ;;  %60 = vmatpush.bf16.msra.mxu0 %v114_v0  ;;  %115 = vmatpush.bf16.msra.mxu1 %v114_v0  ;;  %v112_v5 = vld [vmem:[%s164_s0] sm:$0xff] }
   0x3   :  { %v32_v4 = vunpack.c.l.b16 %v22_v2  ;;  %19 = vst.msk [vmem:[#allocation2 + $0x10] sm:$0xff] %vm16_vm0, %v118_v1 }
   0x5   :  { %v34_v6 = vpack.c.b16 %v32_v4, %v32_v4 }
   0x6   :  { %61 = vmatpush.bf16.msra.mxu0 %v113_v3  ;;  %116 = vmatpush.bf16.msra.mxu1 %v113_v3 }
   0x8   :  { %v72_v7 = vld [vmem:[#allocation2] sm:$0xff] }
   0x9   :  { %110 = vmatmul.msk.bf16.vlgmr.msra.gmra.mxu0 %vm16_vm0, %v112_v5  ;;  %111 = vmatmul.msk.bf16.vlgmr.msra.gmra.mxu1 %vm16_vm0, %v34_v6  ;;  %v73_v13 = vld [vmem:[#allocation2 + $0x8] sm:$0xff] }
   0xa   :  { %v74_v8 = vld [vmem:[#allocation2 + $0x10] sm:$0xff] }
  0x86   :  { %v63_v9 = vpop.f32.mrf.mxu0  ;;  %v68_v10 = vpop.f32.mrf.mxu1 }
  0x87   :  { %v75_v11 = vadd.f32 %v72_v7, %v63_v9  ;;  %v77_v12 = vadd.f32 %v74_v8, %v68_v10 }
  0x89   :  { %78 = vst.msk [vmem:[#allocation2] sm:$0xff] %vm16_vm0, %v75_v11 }
  0x8a   :  { %80 = vst.msk [vmem:[#allocation2 + $0x10] sm:$0xff] %vm16_vm0, %v77_v12 }
  0x8e   :  { %v65_v14 = vpop.f32.mrf.mxu0  ;;  %v70_v15 = vpop.f32.mrf.mxu1 }
  0x8f   :  { %v76_v16 = vadd.f32 %v73_v13, %v65_v14 }
  0x90   :  { %v84_v17 = vld [vmem:[#allocation2] sm:$0xff] }
  0x91   :  { %v87_v18 = vpack.c.bf16 %v84_v17, %v84_v17  ;;  %v86_v19 = vld [vmem:[#allocation2 + $0x10] sm:$0xff]  ;;  %79 = vst.msk [vmem:[#allocation2 + $0x8] sm:$0xff] %vm16_vm0, %v76_v16 }
  0x92   :  { %v89_v20 = vpack.c.bf16 %v86_v19, %v86_v19 }
  0x93   :  { %91 = vst.msk [vmem:[%s165_s2] sm:$0xf] %vm90_vm1, %v87_v18 }
  0x94   :  { %93 = vst.msk [vmem:[%s165_s2 + $0x8] sm:$0xf] %vm90_vm1, %v89_v20 }
  0x98   :  { %v85_v21 = vld [vmem:[#allocation2 + $0x8] sm:$0xff] }
  0x99   :  { %v88_v22 = vpack.c.bf16 %v85_v21, %v85_v21 }
  0x9b   :  { %92 = vst.msk [vmem:[%s165_s2 + $0x4] sm:$0xf] %vm90_vm1, %v88_v22 }

// kernel: soft_text_decoder_v2_forward.32
= control target key start
LH: loop header
LB: loop body
LE: loop exit
PB: predicated region body
PF: predicated region fallthrough
CT: control target
= control target key end

     0   :  { %vm17_vm0 = vcmask 261120   ;;  %v127_v6 = vmov 32.0   ;;  %vm108_vm6 = vcmask 257024   ;;  %s186_s0 = inlined_call_operand.vmem [shape: f32[24,32], index: 0, kind: input, shape index: {}]   ;;  %s187_s1 = inlined_call_operand.vmem [shape: f32[1,32], index: 1, kind: input, shape index: {}]   ;;  %s188_s2 = inlined_call_operand.vmem [shape: f32[1,32], index: 2, kind: input, shape index: {}]   ;;  %s189_s3 = inlined_call_operand.vmem [shape: bf16[24,32], index: 3, kind: output, shape index: {}]  }
   0x1   :  { %v14_v0 = vld [vmem:[%s186_s0] sm:$0xff]  ;;  %v16_v1 = vld [vmem:[%s186_s0 + $0x10] sm:$0xff]  ;;  %v15_v4 = vld [vmem:[%s186_s0 + $0x8] sm:$0xff]  ;;  %119 = vrcp.f32 %v127_v6 }
   0x2   :  { %v18_v2 = vsel %vm17_vm0, %v14_v0, 0.0  ;;  %v24_v3 = vsel %vm17_vm0, %v16_v1, 0.0  ;;  %v21_v5 = vsel %vm17_vm0, %v15_v4, 0.0  ;;  %v117_v45 = vld [vmem:[%s187_s1] ss:$0 sm:$0xff] }
   0x3   :  { %19 = vadd.xlane.f32.xlu0 %v18_v2  ;;  %25 = vadd.xlane.f32.xlu1 %v24_v3  ;;  %v118_v48 = vld [vmem:[%s188_s2] ss:$0 sm:$0xff] }
   0x7   :  { %v120_v7 = vpop.eup %119 }
   0x8   :  { %v28_v8 = vmul.f32 32.0, %v120_v7  ;;  %vm32_vm1 = vweird.f32 %v120_v7 }
   0xa   :  { %v29_v9 = vsub.f32 1.0, %v28_v8 }
   0xb   :  { %22 = vadd.xlane.f32.xlu0 %v21_v5 }
   0xc   :  { %v30_v10 = vmul.f32 %v120_v7, %v29_v9 }
   0xe   :  { %v31_v11 = vadd.f32 %v120_v7, %v30_v10 }
  0x10   :  { %v33_v12 = vsel %vm32_vm1, %v120_v7, %v31_v11 }
  0x76   :  { %v20_v13 = vpop.xlane.xlu0 %19  ;;  %v26_v17 = vpop.xlane.xlu1 %25 }
  0x77   :  { %v34_v14 = vmul.f32 %v33_v12, %v20_v13  ;;  %v36_v21 = vmul.f32 %v33_v12, %v26_v17 }
  0x79   :  { %v37_v15 = vsub.f32 %v14_v0, %v34_v14  ;;  %v161_v23 = vsub.f32 %v16_v1, %v36_v21 }
  0x7b   :  { %v40_v16 = vmul.f32 %v37_v15, %v37_v15  ;;  %v42_v26 = vmul.f32 %v161_v23, %v161_v23 }
  0x7d   :  { %v43_v18 = vsel %vm17_vm0, %v40_v16, 0.0  ;;  %v49_v27 = vsel %vm17_vm0, %v42_v26, 0.0 }
  0x7e   :  { %44 = vadd.xlane.f32.xlu1 %v43_v18  ;;  %v23_v19 = vpop.xlane.xlu0 %22 }
  0x7f   :  { %v35_v20 = vmul.f32 %v33_v12, %v23_v19 }
  0x81   :  { %v38_v22 = vsub.f32 %v15_v4, %v35_v20 }
  0x83   :  { %v41_v24 = vmul.f32 %v38_v22, %v38_v22 }
  0x85   :  { %v46_v25 = vsel %vm17_vm0, %v41_v24, 0.0 }
  0x86   :  { %47 = vadd.xlane.f32.xlu2 %v46_v25 }
  0x8e   :  { %50 = vadd.xlane.f32.xlu2 %v49_v27 }
  0xf1   :  { %v45_v28 = vpop.xlane.xlu1 %44 }
  0xf2   :  { %v52_v29 = vmul.f32 %v45_v28, %v33_v12 }
  0xf4   :  { %v55_v30 = vadd.f32 1e-05, %v52_v29 }
  0xf6   :  { %121 = vrsqrt.f32 %v55_v30  ;;  %vm64_vm3 = vweird.f32 %v55_v30 }
  0xf9   :  { %v48_v31 = vpop.xlane.xlu2 %47 }
  0xfa   :  { %v53_v32 = vmul.f32 %v48_v31, %v33_v12 }
  0xfc   :  { %v122_v33 = vpop.eup %121  ;;  %v56_v34 = vadd.f32 1e-05, %v53_v32 }
  0xfd   :  { %v59_v35 = vmul.f32 %v122_v33, %v55_v30  ;;  %vm65_vm2 = vweird.f32 %v122_v33 }
  0xfe   :  { %123 = vrsqrt.f32 %v56_v34  ;;  %vm66_vm4 = vmor %vm64_vm3, %vm65_vm2  ;;  %vm74_vm7 = vweird.f32 %v56_v34 }
  0xff   :  { %v60_v36 = vmul.f32 %v122_v33, %v59_v35 }
 0x101   :  { %v61_v37 = vmul.f32 0.5, %v60_v36  ;;  %v51_v38 = vpop.xlane.xlu2 %50 }
 0x102   :  { %v54_v39 = vmul.f32 %v51_v38, %v33_v12 }
 0x103   :  { %v62_v40 = vsub.f32 1.5, %v61_v37 }
 0x104   :  { %v124_v41 = vpop.eup %123  ;;  %v57_v42 = vadd.f32 1e-05, %v54_v39 }
 0x105   :  { %v63_v43 = vmul.f32 %v122_v33, %v62_v40  ;;  %v69_v44 = vmul.f32 %v124_v41, %v56_v34  ;;  %vm75_vm5 = vweird.f32 %v124_v41 }
 0x106   :  { %125 = vrsqrt.f32 %v57_v42  ;;  %vm76_vm8 = vmor %vm74_vm7, %vm75_vm5  ;;  %vm84_vm10 = vweird.f32 %v57_v42 }
 0x107   :  { %v67_v46 = vsel %vm66_vm4, %v122_v33, %v63_v43  ;;  %v70_v47 = vmul.f32 %v124_v41, %v69_v44 }
 0x108   :  { %v88_v49 = vmul.f32 %v67_v46, %v37_v15 }
 0x109   :  { %v71_v50 = vmul.f32 0.5, %v70_v47 }
 0x10a   :  { %v95_v51 = vmul.f32 %v117_v45, %v88_v49 }
 0x10b   :  { %v72_v52 = vsub.f32 1.5, %v71_v50 }
 0x10c   :  { %v126_v53 = vpop.eup %125  ;;  %v102_v54 = vadd.f32 %v118_v48, %v95_v51 }
 0x10d   :  { %v73_v55 = vmul.f32 %v124_v41, %v72_v52  ;;  %v79_v56 = vmul.f32 %v126_v53, %v57_v42  ;;  %vm85_vm9 = vweird.f32 %v126_v53 }
 0x10e   :  { %v105_v57 = vpack.c.bf16 %v102_v54, %v102_v54  ;;  %vm86_vm11 = vmor %vm84_vm10, %vm85_vm9 }
 0x10f   :  { %v77_v58 = vsel %vm76_vm8, %v124_v41, %v73_v55  ;;  %v80_v59 = vmul.f32 %v126_v53, %v79_v56 }
 0x110   :  { %109 = vst.msk [vmem:[%s189_s3] sm:$0xf] %vm108_vm6, %v105_v57  ;;  %v89_v60 = vmul.f32 %v77_v58, %v38_v22 }
 0x111   :  { %v81_v61 = vmul.f32 0.5, %v80_v59 }
 0x112   :  { %v96_v62 = vmul.f32 %v117_v45, %v89_v60 }
 0x113   :  { %v82_v63 = vsub.f32 1.5, %v81_v61 }
 0x114   :  { %v103_v0 = vadd.f32 %v118_v48, %v96_v62 }
 0x115   :  { %v83_v1 = vmul.f32 %v126_v53, %v82_v63 }
 0x116   :  { %v106_v2 = vpack.c.bf16 %v103_v0, %v103_v0 }
 0x117   :  { %v87_v3 = vsel %vm86_vm11, %v126_v53, %v83_v1 }
 0x118   :  { %110 = vst.msk [vmem:[%s189_s3 + $0x4] sm:$0xf] %vm108_vm6, %v106_v2  ;;  %v90_v4 = vmul.f32 %v87_v3, %v161_v23 }
 0x11a   :  { %v97_v5 = vmul.f32 %v117_v45, %v90_v4 }
 0x11c   :  { %v104_v6 = vadd.f32 %v118_v48, %v97_v5 }
 0x11e   :  { %v107_v7 = vpack.c.bf16 %v104_v6, %v104_v6 }
 0x120   :  { %111 = vst.msk [vmem:[%s189_s3 + $0x8] sm:$0xf] %vm108_vm6, %v107_v7 }

// kernel: soft_text_decoder_v2_forward.36
= control target key start
LH: loop header
LB: loop body
LE: loop exit
PB: predicated region body
PF: predicated region fallthrough
CT: control target
= control target key end

     0   :  { %s1051_s15 = smov 0   ;;  %s1053_s16 = smov 0   ;;  %s1158_s0 = inlined_call_operand.vmem [shape: bf16[2,4,12,8], index: 0, kind: input, shape index: {}]   ;;  %s1159_s1 = inlined_call_operand.vmem [shape: bf16[2,4,12,8], index: 1, kind: input, shape index: {}]   ;;  %s1160_s2 = inlined_call_operand.vmem [shape: bf16[2,4,12,8], index: 2, kind: input, shape index: {}]   ;;  %s1161_s3 = inlined_call_operand.vmem [shape: f32[12,12], index: 3, kind: input, shape index: {}]   ;;  %s1162_s4 = inlined_call_operand.vmem [shape: bf16[2,4,12,8], index: 4, kind: output, shape index: {}]  }
   0x1   :  { %s1055_s17 = smov 0  }
   0x2 LB: > { %s26_s18 = sadd.s32 1, %s1020_s16  ;;  %p863_p0 = scmp.ge.s32.totalorder %s1024_s17, 1  ;;  %s1024_s17 = sphi %s1055_s17, %s14_s17   ;;  %s1020_s16 = sphi %s1053_s16, %s1164_s16   ;;  %s1016_s15 = sphi %s1051_s15, %s1163_s15  }
   0x3   : > { %p28_p1 = scmp.ge.s32.totalorder %s26_s18, 2  ;;  %p220_p2 = scmp.lt.s32.totalorder %s1024_s17, 3 }
   0x5   : > { %s1166_s18 = smov (%p28_p1, %s26_s18), 0  ;;  %p221_p3 = pnand %p863_p0, %p220_p2 }
   0x6   : > { %p277_p4 = scmp.lt.s32.totalorder (!%p221_p3), %s1016_s15, 1 }
   0x7   : > { %224 = sbr.rel (%p221_p3) target bundleno = 578 (0x242), region = 36 }
   0xc   : > { %s1168_s15 = smov (!%p277_p4, %s1016_s15), 1  ;;  %vm355_vm0 = vcmask 64512   ;;  %v474_v29 = vld [vmem:[%s1161_s3] sm:$0xff]  ;;  %vm484_vm1 = vcmask 97280   ;;  %v475_v39 = vld [vmem:[%s1161_s3 + $0x8] sm:$0xf] }
   0xd   : > { %s1069_s19 = sshll.u32 %s1168_s15, 5  ;;  %vm488_vm2 = vcmask 93184   ;;  %vm595_vm3 = vcmask 1045504   ;;  %vm711_vm4 = vcmask 60416   ;;  %vm713_vm5 = vcmask 58368  }
   0xe   : > { %s296_s22 = scalar_lea.vmem %s1159_s1, %s1069_s19  ;;  %s285_s25 = scalar_lea.vmem %s1158_s0, %s1069_s19 }
   0xf   : > { %v878_v0 = vld [vmem:[%s296_s22] sm:$0xf]  ;;  %v938_v1 = vld [vmem:[%s296_s22] sm:$0x30]  ;;  %v896_v2 = vld [vmem:[%s296_s22 + $0x10] sm:$0xf]  ;;  %s307_s6 = scalar_lea.vmem %s1160_s2, %s1069_s19  ;;  %s318_s9 = scalar_lea.vmem %s1162_s4, %s1069_s19 }
  0x10   : > { %v879_v3 = vor.u32 %v938_v1, %v878_v0  ;;  %v940_v4 = vld [vmem:[%s296_s22 + $0x10] sm:$0x30]  ;;  %v905_v5 = vld [vmem:[%s296_s22 + $0x18] sm:$0xf]  ;;  %v941_v6 = vld [vmem:[%s296_s22 + $0x18] sm:$0x30] }
  0x11   : > { %v897_v7 = vor.u32 %v940_v4, %v896_v2  ;;  %v906_v8 = vor.u32 %v941_v6, %v905_v5  ;;  %v887_v9 = vld [vmem:[%s296_s22 + $0x8] sm:$0xf]  ;;  %v939_v10 = vld [vmem:[%s296_s22 + $0x8] sm:$0x30]  ;;  %v874_v13 = vld [vmem:[%s285_s25] sm:$0xf] }
  0x12   : > { %v360_v11 = vsel %vm355_vm0, %v879_v3, 0  ;;  %v888_v12 = vor.u32 %v939_v10, %v887_v9  ;;  %v934_v14 = vld [vmem:[%s285_s25] sm:$0x30]  ;;  %v892_v17 = vld [vmem:[%s285_s25 + $0x10] sm:$0xf] }
  0x13   : > { %369 = vmatpush.bf16.xpose.msra.mxu0 %v360_v11  ;;  %v420_v15 = vsel %vm355_vm0, %v897_v7, 0  ;;  %v450_v16 = vsel %vm355_vm0, %v906_v8, 0  ;;  %v936_v18 = vld [vmem:[%s285_s25 + $0x10] sm:$0x30]  ;;  %v901_v20 = vld [vmem:[%s285_s25 + $0x18] sm:$0xf]  ;;  %v875_v24 = vor.u32 %v934_v14, %v874_v13 }
  0x14   : > { %429 = vmatpush.bf16.xpose.msra.mxu2 %v420_v15  ;;  %459 = vmatpush.bf16.xpose.msra.mxu3 %v450_v16  ;;  %v390_v19 = vsel %vm355_vm0, %v888_v12, 0  ;;  %v937_v21 = vld [vmem:[%s285_s25 + $0x18] sm:$0x30]  ;;  %v883_v22 = vld [vmem:[%s285_s25 + $0x8] sm:$0xf]  ;;  %v893_v25 = vor.u32 %v936_v18, %v892_v17 }
  0x15   : > { %399 = vmatpush.bf16.xpose.msra.mxu1 %v390_v19  ;;  %v935_v23 = vld [vmem:[%s285_s25 + $0x8] sm:$0x30]  ;;  %v902_v26 = vor.u32 %v937_v21, %v901_v20 }
  0x16   : > { %v884_v27 = vor.u32 %v935_v23, %v883_v22 }
  0x1a   : > { %880 = vmatmul.msk.bf16.vlgmr.msra.gmra.mxu0 %vm355_vm0, %v875_v24 }
  0x1b   : > { %898 = vmatmul.msk.bf16.vlgmr.msra.gmra.mxu2 %vm355_vm0, %v893_v25  ;;  %907 = vmatmul.msk.bf16.vlgmr.msra.gmra.mxu3 %vm355_vm0, %v902_v26 }
  0x1c   : > { %889 = vmatmul.msk.bf16.vlgmr.msra.gmra.mxu1 %vm355_vm0, %v884_v27 }
  0x97   : > { %v371_v28 = vpop.f32.mrf.mxu0 }
  0x98   : > { %v466_v30 = vmul.f32 0.35355338, %v371_v28 }
  0x99   : > { %v401_v33 = vpop.f32.mrf.mxu1 }
  0x9a   : > { %v476_v31 = vadd.f32 %v474_v29, %v466_v30  ;;  %v468_v54 = vmul.f32 0.35355338, %v401_v33 }
  0x9c   : > { %v485_v32 = vsel %vm484_vm1, %v476_v31, -inf  ;;  %v478_v58 = vadd.f32 %v474_v29, %v468_v54 }
  0x9d   : > { %486 = vmax.xlane.f32.xlu2 %v485_v32 }
  0x9e   : > { %v431_v34 = vpop.f32.mrf.mxu2  ;;  %v461_v35 = vpop.f32.mrf.mxu3  ;;  %v492_v60 = vsel %vm484_vm1, %v478_v58, -inf }
  0x9f   : > { %v470_v36 = vmul.f32 0.35355338, %v431_v34  ;;  %v472_v37 = vmul.f32 0.35355338, %v461_v35  ;;  %v373_v38 = vpop.f32.mrf.mxu0 }
  0xa0   : > { %v467_v40 = vmul.f32 0.35355338, %v373_v38  ;;  %v920_v38 = vld [vmem:[%s307_s6 + $0x10] sm:$0xf] }
  0xa1   : > { %v482_v41 = vadd.f32 %v474_v29, %v472_v37  ;;  %v480_v42 = vadd.f32 %v474_v29, %v470_v36  ;;  %v403_v51 = vpop.f32.mrf.mxu1 }
  0xa2   : > { %v477_v43 = vadd.f32 %v475_v39, %v467_v40  ;;  %v469_v55 = vmul.f32 0.35355338, %v403_v51  ;;  %v925_v40 = vld [vmem:[%s307_s6 + $0x18] sm:$0xf] }
  0xa3   : > { %v504_v44 = vsel %vm484_vm1, %v482_v41, -inf  ;;  %v498_v45 = vsel %vm484_vm1, %v480_v42, -inf }
  0xa4   : > { %505 = vmax.xlane.f32.xlu1 %v504_v44  ;;  %499 = vmax.xlane.f32.xlu0 %v498_v45  ;;  %v489_v46 = vsel %vm488_vm2, %v477_v43, -inf  ;;  %v479_v59 = vadd.f32 %v475_v39, %v469_v55  ;;  %v942_v44 = vld [vmem:[%s307_s6] sm:$0x30] }
  0xa5   : > { %490 = vmax.xlane.f32.xlu2 %v489_v46 }
  0xa6   : > { %v433_v47 = vpop.f32.mrf.mxu2  ;;  %v463_v48 = vpop.f32.mrf.mxu3  ;;  %v495_v61 = vsel %vm488_vm2, %v479_v59, -inf }
  0xa7   : > { %v471_v49 = vmul.f32 0.35355338, %v433_v47  ;;  %v473_v50 = vmul.f32 0.35355338, %v463_v48  ;;  %v915_v48 = vld [vmem:[%s307_s6 + $0x8] sm:$0xf] }
  0xa9   : > { %v483_v52 = vadd.f32 %v475_v39, %v473_v50  ;;  %v481_v53 = vadd.f32 %v475_v39, %v471_v49  ;;  %v944_v39 = vld [vmem:[%s307_s6 + $0x10] sm:$0x30]  ;;  %v943_v49 = vld [vmem:[%s307_s6 + $0x8] sm:$0x30] }
  0xab   : > { %v507_v56 = vsel %vm488_vm2, %v483_v52, -inf  ;;  %v501_v57 = vsel %vm488_vm2, %v481_v53, -inf }
  0xac   : > { %508 = vmax.xlane.f32.xlu1 %v507_v56  ;;  %502 = vmax.xlane.f32.xlu0 %v501_v57 }
  0xb4   : > { %493 = vmax.xlane.f32.xlu0 %v492_v60  ;;  %496 = vmax.xlane.f32.xlu1 %v495_v61 }
 0x110   : > { %v487_v62 = vpop.xlane.xlu2 %486 }
 0x111   : > { %v510_v63 = vsub.f32 %v476_v31, %v487_v62 }
 0x113   : > { %v518_v0 = vmul.f32 1.442695, %v510_v63 }
 0x115   : > { %970 = vpow2.f32 %v518_v0 }
 0x117   : > { %v506_v1 = vpop.xlane.xlu1 %505  ;;  %v500_v2 = vpop.xlane.xlu0 %499 }
 0x118   : > { %v516_v3 = vsub.f32 %v482_v41, %v506_v1  ;;  %v514_v4 = vsub.f32 %v480_v42, %v500_v2  ;;  %v491_v5 = vpop.xlane.xlu2 %490  ;;  %v921_v41 = vor.u32 %v944_v39, %v920_v38  ;;  %v945_v42 = vld [vmem:[%s307_s6 + $0x18] sm:$0x30] }
 0x119   : > { %v511_v8 = vsub.f32 %v477_v43, %v491_v5  ;;  %v910_v43 = vld [vmem:[%s307_s6] sm:$0xf]  ;;  %v926_v45 = vor.u32 %v945_v42, %v925_v40 }
 0x11a   : > { %v530_v6 = vmul.f32 1.442695, %v516_v3  ;;  %v526_v7 = vmul.f32 1.442695, %v514_v4  ;;  %v911_v46 = vor.u32 %v942_v44, %v910_v43  ;;  %v657_v47 = vsel %vm595_vm3, %v921_v41, 0 }
 0x11b   : > { %v1101_v9 = vpop.eup %970  ;;  %v520_v11 = vmul.f32 1.442695, %v511_v8  ;;  %666 = vmatpush.bf16.msrb.mxu2 %v657_v47  ;;  %v687_v50 = vsel %vm595_vm3, %v926_v45, 0 }
 0x11c   : > { %972 = vpow2.f32 %v530_v6  ;;  %v534_v10 = vsel %vm484_vm1, %v1101_v9, 0.0  ;;  %v597_v51 = vsel %vm595_vm3, %v911_v46, 0  ;;  %696 = vmatpush.bf16.msrb.mxu3 %v687_v50 }
 0x11d   : > { %974 = vpow2.f32 %v526_v7  ;;  %535 = vadd.xlane.f32.xlu0 %v534_v10  ;;  %606 = vmatpush.bf16.msrb.mxu0 %v597_v51 }
 0x11e   : > { %976 = vpow2.f32 %v520_v11 }
 0x11f   : > { %v509_v12 = vpop.xlane.xlu1 %508  ;;  %v503_v13 = vpop.xlane.xlu0 %502 }
 0x120   : > { %v517_v14 = vsub.f32 %v483_v52, %v509_v12  ;;  %v515_v15 = vsub.f32 %v481_v53, %v503_v13  ;;  %v916_v52 = vor.u32 %v943_v49, %v915_v48 }
 0x122   : > { %v1105_v16 = vpop.eup %972  ;;  %v532_v17 = vmul.f32 1.442695, %v517_v14  ;;  %v528_v18 = vmul.f32 1.442695, %v515_v15  ;;  %v627_v53 = vsel %vm595_vm3, %v916_v52, 0 }
 0x123   : > { %v1107_v19 = vpop.eup %974  ;;  %v552_v20 = vsel %vm484_vm1, %v1105_v16, 0.0  ;;  %636 = vmatpush.bf16.msrb.mxu1 %v627_v53 }
 0x124   : > { %978 = vpow2.f32 %v532_v17  ;;  %553 = vadd.xlane.f32.xlu1 %v552_v20  ;;  %v546_v21 = vsel %vm484_vm1, %v1107_v19, 0.0  ;;  %v1113_v24 = vpop.eup %976 }
 0x125   : > { %980 = vpow2.f32 %v528_v18  ;;  %547 = vadd.xlane.f32.xlu2 %v546_v21  ;;  %v537_v32 = vsel %vm488_vm2, %v1113_v24, 0.0 }
 0x127   : > { %v494_v22 = vpop.xlane.xlu0 %493  ;;  %v497_v23 = vpop.xlane.xlu1 %496 }
 0x128   : > { %v512_v25 = vsub.f32 %v478_v58, %v494_v22  ;;  %v513_v26 = vsub.f32 %v479_v59, %v497_v23 }
 0x12a   : > { %v1115_v27 = vpop.eup %978  ;;  %v522_v28 = vmul.f32 1.442695, %v512_v25  ;;  %v524_v29 = vmul.f32 1.442695, %v513_v26 }
 0x12b   : > { %v981_v30 = vpop.eup %980  ;;  %v555_v31 = vsel %vm488_vm2, %v1115_v27, 0.0 }
 0x12c   : > { %982 = vpow2.f32 %v522_v28  ;;  %v549_v33 = vsel %vm488_vm2, %v981_v30, 0.0  ;;  %538 = vadd.xlane.f32.xlu1 %v537_v32 }
 0x12d   : > { %984 = vpow2.f32 %v524_v29  ;;  %550 = vadd.xlane.f32.xlu0 %v549_v33  ;;  %556 = vadd.xlane.f32.xlu2 %v555_v31 }
 0x132   : > { %v1122_v34 = vpop.eup %982 }
 0x133   : > { %v1124_v35 = vpop.eup %984  ;;  %v540_v36 = vsel %vm484_vm1, %v1122_v34, 0.0 }
 0x134   : > { %v543_v37 = vsel %vm488_vm2, %v1124_v35, 0.0 }
 0x135   : > { %544 = vadd.xlane.f32.xlu0 %v543_v37  ;;  %541 = vadd.xlane.f32.xlu2 %v540_v36 }
 0x190   : > { %v536_v54 = vpop.xlane.xlu0 %535 }
 0x191   : > { %986 = vrcp.f32 %v536_v54 }
 0x197   : > { %v554_v55 = vpop.xlane.xlu1 %553  ;;  %v987_v58 = vpop.eup %986 }
 0x198   : > { %v548_v56 = vpop.xlane.xlu2 %547  ;;  %v566_v63 = vmul.f32 %v987_v58, %v1101_v9 }
 0x199   : > { %988 = vrcp.f32 %v548_v56 }
 0x19a   : > { %990 = vrcp.f32 %v554_v55  ;;  %v574_v4 = vpack.c.bf16 %v566_v63, %v566_v63 }
 0x19c   : > { %v584_v15 = vunpack.c.l.b16 %v574_v4 }
 0x19f   : > { %v539_v57 = vpop.xlane.xlu1 %538  ;;  %v989_v61 = vpop.eup %988 }
 0x1a0   : > { %v551_v59 = vpop.xlane.xlu0 %550  ;;  %992 = vrcp.f32 %v539_v57  ;;  %v557_v60 = vpop.xlane.xlu2 %556  ;;  %v570_v0 = vmul.f32 %v989_v61, %v1107_v19 }
 0x1a1   : > { %994 = vrcp.f32 %v551_v59  ;;  %v991_v62 = vpop.eup %990 }
 0x1a2   : > { %996 = vrcp.f32 %v557_v60  ;;  %v572_v1 = vmul.f32 %v991_v62, %v1105_v16  ;;  %v578_v7 = vpack.c.bf16 %v570_v0, %v570_v0 }
 0x1a4   : > { %v580_v12 = vpack.c.bf16 %v572_v1, %v572_v1  ;;  %v645_v18 = vunpack.c.l.b16 %v578_v7 }
 0x1a6   : > { %v993_v2 = vpop.eup %992  ;;  %v675_v20 = vunpack.c.l.b16 %v580_v12 }
 0x1a7   : > { %v995_v3 = vpop.eup %994  ;;  %v567_v5 = vmul.f32 %v993_v2, %v1113_v24 }
 0x1a8   : > { %v997_v6 = vpop.eup %996  ;;  %v571_v8 = vmul.f32 %v995_v3, %v981_v30  ;;  %v545_v10 = vpop.xlane.xlu0 %544 }
 0x1a9   : > { %v542_v11 = vpop.xlane.xlu2 %541  ;;  %v575_v13 = vpack.c.bf16 %v567_v5, %v567_v5  ;;  %v573_v14 = vmul.f32 %v997_v6, %v1115_v27  ;;  %998 = vrcp.f32 %v545_v10 }
 0x1aa   : > { %v579_v9 = vpack.c.bf16 %v571_v8, %v571_v8  ;;  %1000 = vrcp.f32 %v542_v11 }
 0x1ab   : > { %v585_v17 = vunpack.c.l.b16 %v575_v13  ;;  %v581_v16 = vpack.c.bf16 %v573_v14, %v573_v14 }
 0x1ac   : > { %v646_v19 = vunpack.c.l.b16 %v579_v9 }
 0x1ad   : > { %v676_v21 = vunpack.c.l.b16 %v581_v16  ;;  %v586_v22 = vpack.c.b16 %v585_v17, %v584_v15 }
 0x1ae   : > { %v647_v23 = vpack.c.b16 %v646_v19, %v645_v18 }
 0x1af   : > { %v999_v24 = vpop.eup %998  ;;  %912 = vmatmul.msk.bf16.vlgmr.msrb.gmra.mxu0 %vm484_vm1, %v586_v22  ;;  %v677_v25 = vpack.c.b16 %v676_v21, %v675_v20 }
 0x1b0   : > { %v1001_v26 = vpop.eup %1000  ;;  %v569_v27 = vmul.f32 %v999_v24, %v1124_v35  ;;  %922 = vmatmul.msk.bf16.vlgmr.msrb.gmra.mxu2 %vm484_vm1, %v647_v23 }
 0x1b1   : > { %v568_v28 = vmul.f32 %v1001_v26, %v1122_v34  ;;  %927 = vmatmul.msk.bf16.vlgmr.msrb.gmra.mxu3 %vm484_vm1, %v677_v25 }
 0x1b2   : > { %v577_v29 = vpack.c.bf16 %v569_v27, %v569_v27 }
 0x1b3   : > { %v576_v30 = vpack.c.bf16 %v568_v28, %v568_v28 }
 0x1b4   : > { %v616_v31 = vunpack.c.l.b16 %v577_v29 }
 0x1b5   : > { %v615_v32 = vunpack.c.l.b16 %v576_v30 }
 0x1b7   : > { %v617_v33 = vpack.c.b16 %v616_v31, %v615_v32 }
 0x1b9   : > { %917 = vmatmul.msk.bf16.vlgmr.msrb.gmra.mxu1 %vm484_vm1, %v617_v33 }
 0x22c   : > { %v608_v36 = vpop.f32.mrf.mxu0 }
 0x22d   : > { %v703_v35 = vpack.c.bf16 %v608_v36, %v608_v36 }
 0x22f   : > { %712 = vst.msk [vmem:[%s318_s9] sm:$0xf] %vm711_vm4, %v703_v35 }
 0x233   : > { %v668_v37 = vpop.f32.mrf.mxu2 }
 0x234   : > { %v707_v38 = vpack.c.bf16 %v668_v37, %v668_v37  ;;  %v698_v34 = vpop.f32.mrf.mxu3  ;;  %v610_v39 = vpop.f32.mrf.mxu0 }
 0x235   : > { %v709_v40 = vpack.c.bf16 %v698_v34, %v698_v34  ;;  %v704_v41 = vpack.c.bf16 %v610_v39, %v610_v39 }
 0x236   : > { %717 = vst.msk [vmem:[%s318_s9 + $0x10] sm:$0xf] %vm711_vm4, %v707_v38  ;;  %v638_v42 = vpop.f32.mrf.mxu1 }
 0x237   : > { %719 = vst.msk [vmem:[%s318_s9 + $0x18] sm:$0xf] %vm711_vm4, %v709_v40  ;;  %v705_v43 = vpack.c.bf16 %v638_v42, %v638_v42 }
 0x238   : > { %714 = vst.msk [vmem:[%s318_s9 + $0x4] sm:$0x3] %vm713_vm5, %v704_v41 }
 0x239   : > { %715 = vst.msk [vmem:[%s318_s9 + $0x8] sm:$0xf] %vm711_vm4, %v705_v43 }
 0x23b   : > { %v670_v44 = vpop.f32.mrf.mxu2 }
 0x23c   : > { %v708_v45 = vpack.c.bf16 %v670_v44, %v670_v44  ;;  %v700_v46 = vpop.f32.mrf.mxu3 }
 0x23d   : > { %v710_v47 = vpack.c.bf16 %v700_v46, %v700_v46 }
 0x23e   : > { %718 = vst.msk [vmem:[%s318_s9 + $0x14] sm:$0x3] %vm713_vm5, %v708_v45  ;;  %v640_v48 = vpop.f32.mrf.mxu1 }
 0x23f   : > { %720 = vst.msk [vmem:[%s318_s9 + $0x1c] sm:$0x3] %vm713_vm5, %v710_v47  ;;  %v706_v49 = vpack.c.bf16 %v640_v48, %v640_v48 }
 0x241   : > { %716 = vst.msk [vmem:[%s318_s9 + $0xc] sm:$0x3] %vm713_vm5, %v706_v49 }
 0x242 PF: > { %s14_s17 = sadd.s32 1, %s1024_s17   ;;  %s1163_s15 = smov %s1020_s16 }
 0x243   : > { %p11_p5 = scmp.ge.s32.totalorder %s14_s17, 4   ;;  %s1164_s16 = smov %s1166_s18 }
 0x245   :  { %13 = sbr.rel (!%p11_p5) target bundleno = 2 (0x2), region = 72 }

// kernel: soft_text_decoder_v2_forward.37
= control target key start
LH: loop header
LB: loop body
LE: loop exit
PB: predicated region body
PF: predicated region fallthrough
CT: control target
= control target key end

     0   :  { %vm22_vm0 = vcmask 261120   ;;  %v134_v1 = vmov 0.0   ;;  %s204_s1 = inlined_call_operand.vmem [shape: bf16[32,32], index: 1, kind: input, shape index: {}]   ;;  %s205_s0 = inlined_call_operand.vmem [shape: bf16[24,32], index: 0, kind: input, shape index: {}]   ;;  %s206_s2 = inlined_call_operand.vmem [shape: f32[1,32], index: 2, kind: input, shape index: {}]   ;;  %s207_s3 = inlined_call_operand.vmem [shape: f32[24,32], index: 3, kind: input, shape index: {}]   ;;  %s208_s4 = inlined_call_operand.vmem [shape: f32[24,32], index: 4, kind: output, shape index: {}]  }
   0x1   :  { %v129_v0 = vld [vmem:[%s204_s1 + $0x8] sm:$0xff]  ;;  %23 = vst.msk [vmem:[#allocation2] sm:$0xff] %vm22_vm0, %v134_v1  ;;  %v128_v3 = vld [vmem:[%s204_s1] sm:$0xff]  ;;  %v102_v22 = vld [vmem:[%s207_s3 + $0x10] sm:$0xff] }
   0x2   :  { %v28_v2 = vld [vmem:[%s205_s0 + $0x8] sm:$0xf]  ;;  %24 = vst.msk [vmem:[#allocation2 + $0x8] sm:$0xff] %vm22_vm0, %v134_v1  ;;  %66 = vmatpush.bf16.msra.mxu0 %v129_v0  ;;  %130 = vmatpush.bf16.msra.mxu1 %v129_v0  ;;  %v127_v5 = vld [vmem:[%s205_s0] sm:$0xff] }
   0x3   :  { %v38_v4 = vunpack.c.l.b16 %v28_v2  ;;  %25 = vst.msk [vmem:[#allocation2 + $0x10] sm:$0xff] %vm22_vm0, %v134_v1  ;;  %v133_v14 = vld [vmem:[%s206_s2] ss:$0 sm:$0xff]  ;;  %v101_v27 = vld [vmem:[%s207_s3 + $0x8] sm:$0xff] }
   0x4   :  { %v100_v19 = vld [vmem:[%s207_s3] sm:$0xff] }
   0x5   :  { %v40_v6 = vpack.c.b16 %v38_v4, %v38_v4 }
   0x6   :  { %67 = vmatpush.bf16.msra.mxu0 %v128_v3  ;;  %131 = vmatpush.bf16.msra.mxu1 %v128_v3 }
   0x8   :  { %v78_v7 = vld [vmem:[#allocation2] sm:$0xff] }
   0x9   :  { %125 = vmatmul.msk.bf16.vlgmr.msra.gmra.mxu0 %vm22_vm0, %v127_v5  ;;  %126 = vmatmul.msk.bf16.vlgmr.msra.gmra.mxu1 %vm22_vm0, %v40_v6  ;;  %v79_v13 = vld [vmem:[#allocation2 + $0x8] sm:$0xff] }
   0xa   :  { %v80_v8 = vld [vmem:[#allocation2 + $0x10] sm:$0xff] }
  0x86   :  { %v69_v9 = vpop.f32.mrf.mxu0  ;;  %v74_v10 = vpop.f32.mrf.mxu1 }
  0x87   :  { %v81_v11 = vadd.f32 %v78_v7, %v69_v9  ;;  %v83_v12 = vadd.f32 %v80_v8, %v74_v10 }
  0x89   :  { %84 = vst.msk [vmem:[#allocation2] sm:$0xff] %vm22_vm0, %v81_v11 }
  0x8a   :  { %86 = vst.msk [vmem:[#allocation2 + $0x10] sm:$0xff] %vm22_vm0, %v83_v12 }
  0x8e   :  { %v71_v15 = vpop.f32.mrf.mxu0  ;;  %v76_v16 = vpop.f32.mrf.mxu1 }
  0x8f   :  { %v82_v17 = vadd.f32 %v79_v13, %v71_v15 }
  0x90   :  { %v90_v18 = vld [vmem:[#allocation2] sm:$0xff] }
  0x91   :  { %v97_v20 = vadd.f32 %v133_v14, %v90_v18  ;;  %v92_v21 = vld [vmem:[#allocation2 + $0x10] sm:$0xff]  ;;  %85 = vst.msk [vmem:[#allocation2 + $0x8] sm:$0xff] %vm22_vm0, %v82_v17 }
  0x92   :  { %v99_v23 = vadd.f32 %v133_v14, %v92_v21 }
  0x93   :  { %v103_v24 = vadd.f32 %v100_v19, %v97_v20 }
  0x94   :  { %v105_v25 = vadd.f32 %v102_v22, %v99_v23 }
  0x95   :  { %106 = vst.msk [vmem:[%s208_s4] sm:$0xff] %vm22_vm0, %v103_v24 }
  0x96   :  { %108 = vst.msk [vmem:[%s208_s4 + $0x10] sm:$0xff] %vm22_vm0, %v105_v25 }
  0x98   :  { %v91_v26 = vld [vmem:[#allocation2 + $0x8] sm:$0xff] }
  0x99   :  { %v98_v28 = vadd.f32 %v133_v14, %v91_v26 }
  0x9b   :  { %v104_v29 = vadd.f32 %v101_v27, %v98_v28 }
  0x9d   :  { %107 = vst.msk [vmem:[%s208_s4 + $0x8] sm:$0xff] %vm22_vm0, %v104_v29 }

// kernel: soft_text_decoder_v2_forward.41
= control target key start
LH: loop header
LB: loop body
LE: loop exit
PB: predicated region body
PF: predicated region fallthrough
CT: control target
= control target key end

     0   :  { %vm19_vm0 = vcmask 261120   ;;  %v146_v1 = vmov 0.0   ;;  %vm111_vm1 = vcmask 257024   ;;  %s204_s1 = inlined_call_operand.vmem [shape: bf16[32,32], index: 1, kind: input, shape index: {}]   ;;  %s205_s2 = inlined_call_operand.vmem [shape: f32[1,32], index: 2, kind: input, shape index: {}]   ;;  %s206_s0 = inlined_call_operand.vmem [shape: bf16[32,32], index: 0, kind: input, shape index: {}]   ;;  %s207_s3 = inlined_call_operand.vmem [shape: bf16[32,32], index: 3, kind: output, shape index: {}]  }
   0x1   :  { %v141_v0 = vld [vmem:[%s204_s1 + $0x8] sm:$0xff]  ;;  %20 = vst.msk [vmem:[#allocation2] sm:$0xff] %vm19_vm0, %v146_v1  ;;  %v140_v2 = vld [vmem:[%s204_s1] sm:$0xff] }
   0x2   :  { %21 = vst.msk [vmem:[#allocation2 + $0x8] sm:$0xff] %vm19_vm0, %v146_v1  ;;  %67 = vmatpush.bf16.msra.mxu0 %v141_v0  ;;  %142 = vmatpush.bf16.msra.mxu1 %v141_v0  ;;  %v138_v3 = vld [vmem:[%s206_s0] sm:$0xff]  ;;  %v139_v4 = vld [vmem:[%s206_s0 + $0x8] sm:$0xff] }
   0x3   :  { %22 = vst.msk [vmem:[#allocation2 + $0x10] sm:$0xff] %vm19_vm0, %v146_v1  ;;  %v145_v13 = vld [vmem:[%s205_s2] ss:$0 sm:$0xff] }
   0x4   :  { %23 = vst.msk [vmem:[#allocation2 + $0x18] sm:$0xff] %vm19_vm0, %v146_v1 }
   0x6   :  { %68 = vmatpush.bf16.msra.mxu0 %v140_v2  ;;  %143 = vmatpush.bf16.msra.mxu1 %v140_v2 }
   0x8   :  { %v80_v5 = vld [vmem:[#allocation2] sm:$0xff] }
   0x9   :  { %136 = vmatmul.msk.bf16.vlgmr.msra.gmra.mxu0 %vm19_vm0, %v138_v3  ;;  %137 = vmatmul.msk.bf16.vlgmr.msra.gmra.mxu1 %vm19_vm0, %v139_v4  ;;  %v81_v11 = vld [vmem:[#allocation2 + $0x8] sm:$0xff] }
   0xa   :  { %v82_v6 = vld [vmem:[#allocation2 + $0x10] sm:$0xff] }
   0xb   :  { %v83_v12 = vld [vmem:[#allocation2 + $0x18] sm:$0xff] }
  0x86   :  { %v70_v7 = vpop.f32.mrf.mxu0  ;;  %v75_v8 = vpop.f32.mrf.mxu1 }
  0x87   :  { %v84_v9 = vadd.f32 %v80_v5, %v70_v7  ;;  %v86_v10 = vadd.f32 %v82_v6, %v75_v8 }
  0x89   :  { %88 = vst.msk [vmem:[#allocation2] sm:$0xff] %vm19_vm0, %v84_v9 }
  0x8a   :  { %90 = vst.msk [vmem:[#allocation2 + $0x10] sm:$0xff] %vm19_vm0, %v86_v10 }
  0x8e   :  { %v72_v14 = vpop.f32.mrf.mxu0  ;;  %v77_v15 = vpop.f32.mrf.mxu1 }
  0x8f   :  { %v85_v16 = vadd.f32 %v81_v11, %v72_v14  ;;  %v87_v17 = vadd.f32 %v83_v12, %v77_v15 }
  0x90   :  { %v95_v18 = vld [vmem:[#allocation2] sm:$0xff] }
  0x91   :  { %v103_v19 = vadd.f32 %v145_v13, %v95_v18  ;;  %v97_v20 = vld [vmem:[#allocation2 + $0x10] sm:$0xff]  ;;  %89 = vst.msk [vmem:[#allocation2 + $0x8] sm:$0xff] %vm19_vm0, %v85_v16 }
  0x92   :  { %v105_v21 = vadd.f32 %v145_v13, %v97_v20  ;;  %91 = vst.msk [vmem:[#allocation2 + $0x18] sm:$0xff] %vm19_vm0, %v87_v17 }
  0x93   :  { %v107_v22 = vpack.c.bf16 %v103_v19, %v103_v19 }
  0x94   :  { %v109_v23 = vpack.c.bf16 %v105_v21, %v105_v21 }
  0x95   :  { %112 = vst.msk [vmem:[%s207_s3] sm:$0xf] %vm111_vm1, %v107_v22 }
  0x96   :  { %114 = vst.msk [vmem:[%s207_s3 + $0x8] sm:$0xf] %vm111_vm1, %v109_v23 }
  0x98   :  { %v96_v24 = vld [vmem:[#allocation2 + $0x8] sm:$0xff] }
  0x99   :  { %v104_v25 = vadd.f32 %v145_v13, %v96_v24  ;;  %v98_v26 = vld [vmem:[#allocation2 + $0x18] sm:$0xff] }
  0x9a   :  { %v106_v27 = vadd.f32 %v145_v13, %v98_v26 }
  0x9b   :  { %v108_v28 = vpack.c.bf16 %v104_v25, %v104_v25 }
  0x9c   :  { %v110_v29 = vpack.c.bf16 %v106_v27, %v106_v27 }
  0x9d   :  { %113 = vst.msk [vmem:[%s207_s3 + $0x4] sm:$0xf] %vm111_vm1, %v108_v28 }
  0x9e   :  { %115 = vst.msk [vmem:[%s207_s3 + $0xc] sm:$0xf] %vm111_vm1, %v110_v29 }

// kernel: soft_text_decoder_v2_forward.40
= control target key start
LH: loop header
LB: loop body
LE: loop exit
PB: predicated region body
PF: predicated region fallthrough
CT: control target
= control target key end

     0   :  { %vm16_vm0 = vcmask 261120   ;;  %v134_v1 = vmov 0.0   ;;  %vm100_vm1 = vcmask 257024   ;;  %s184_s1 = inlined_call_operand.vmem [shape: bf16[32,32], index: 1, kind: input, shape index: {}]   ;;  %s185_s0 = inlined_call_operand.vmem [shape: bf16[32,32], index: 0, kind: input, shape index: {}]   ;;  %s186_s2 = inlined_call_operand.vmem [shape: bf16[32,32], index: 2, kind: output, shape index: {}]  }
   0x1   :  { %v130_v0 = vld [vmem:[%s184_s1 + $0x8] sm:$0xff]  ;;  %17 = vst.msk [vmem:[#allocation2] sm:$0xff] %vm16_vm0, %v134_v1  ;;  %v129_v2 = vld [vmem:[%s184_s1] sm:$0xff] }
   0x2   :  { %18 = vst.msk [vmem:[#allocation2 + $0x8] sm:$0xff] %vm16_vm0, %v134_v1  ;;  %64 = vmatpush.bf16.msra.mxu0 %v130_v0  ;;  %131 = vmatpush.bf16.msra.mxu1 %v130_v0  ;;  %v127_v3 = vld [vmem:[%s185_s0] sm:$0xff]  ;;  %v128_v4 = vld [vmem:[%s185_s0 + $0x8] sm:$0xff] }
   0x3   :  { %19 = vst.msk [vmem:[#allocation2 + $0x10] sm:$0xff] %vm16_vm0, %v134_v1 }
   0x4   :  { %20 = vst.msk [vmem:[#allocation2 + $0x18] sm:$0xff] %vm16_vm0, %v134_v1 }
   0x6   :  { %65 = vmatpush.bf16.msra.mxu0 %v129_v2  ;;  %132 = vmatpush.bf16.msra.mxu1 %v129_v2 }
   0x8   :  { %v77_v5 = vld [vmem:[#allocation2] sm:$0xff] }
   0x9   :  { %125 = vmatmul.msk.bf16.vlgmr.msra.gmra.mxu0 %vm16_vm0, %v127_v3  ;;  %126 = vmatmul.msk.bf16.vlgmr.msra.gmra.mxu1 %vm16_vm0, %v128_v4  ;;  %v78_v11 = vld [vmem:[#allocation2 + $0x8] sm:$0xff] }
   0xa   :  { %v79_v6 = vld [vmem:[#allocation2 + $0x10] sm:$0xff] }
   0xb   :  { %v80_v12 = vld [vmem:[#allocation2 + $0x18] sm:$0xff] }
  0x86   :  { %v67_v7 = vpop.f32.mrf.mxu0  ;;  %v72_v8 = vpop.f32.mrf.mxu1 }
  0x87   :  { %v81_v9 = vadd.f32 %v77_v5, %v67_v7  ;;  %v83_v10 = vadd.f32 %v79_v6, %v72_v8 }
  0x89   :  { %85 = vst.msk [vmem:[#allocation2] sm:$0xff] %vm16_vm0, %v81_v9 }
  0x8a   :  { %87 = vst.msk [vmem:[#allocation2 + $0x10] sm:$0xff] %vm16_vm0, %v83_v10 }
  0x8e   :  { %v69_v13 = vpop.f32.mrf.mxu0  ;;  %v74_v14 = vpop.f32.mrf.mxu1 }
  0x8f   :  { %v82_v15 = vadd.f32 %v78_v11, %v69_v13  ;;  %v84_v16 = vadd.f32 %v80_v12, %v74_v14 }
  0x90   :  { %v92_v17 = vld [vmem:[#allocation2] sm:$0xff] }
  0x91   :  { %v96_v18 = vpack.c.bf16 %v92_v17, %v92_v17  ;;  %v94_v19 = vld [vmem:[#allocation2 + $0x10] sm:$0xff]  ;;  %86 = vst.msk [vmem:[#allocation2 + $0x8] sm:$0xff] %vm16_vm0, %v82_v15 }
  0x92   :  { %v98_v20 = vpack.c.bf16 %v94_v19, %v94_v19  ;;  %88 = vst.msk [vmem:[#allocation2 + $0x18] sm:$0xff] %vm16_vm0, %v84_v16 }
  0x93   :  { %101 = vst.msk [vmem:[%s186_s2] sm:$0xf] %vm100_vm1, %v96_v18 }
  0x94   :  { %103 = vst.msk [vmem:[%s186_s2 + $0x8] sm:$0xf] %vm100_vm1, %v98_v20 }
  0x98   :  { %v93_v21 = vld [vmem:[#allocation2 + $0x8] sm:$0xff] }
  0x99   :  { %v97_v22 = vpack.c.bf16 %v93_v21, %v93_v21  ;;  %v95_v23 = vld [vmem:[#allocation2 + $0x18] sm:$0xff] }
  0x9a   :  { %v99_v24 = vpack.c.bf16 %v95_v23, %v95_v23 }
  0x9b   :  { %102 = vst.msk [vmem:[%s186_s2 + $0x4] sm:$0xf] %vm100_vm1, %v97_v22 }
  0x9c   :  { %104 = vst.msk [vmem:[%s186_s2 + $0xc] sm:$0xf] %vm100_vm1, %v99_v24 }

// kernel: soft_text_decoder_v2_forward.42
= control target key start
LH: loop header
LB: loop body
LE: loop exit
PB: predicated region body
PF: predicated region fallthrough
CT: control target
= control target key end

     0   :  { %s1000_s12 = smov 0   ;;  %s1002_s13 = smov 0   ;;  %s1081_s0 = inlined_call_operand.vmem [shape: bf16[2,4,12,8], index: 0, kind: input, shape index: {}]   ;;  %s1082_s1 = inlined_call_operand.vmem [shape: bf16[2,4,16,8], index: 1, kind: input, shape index: {}]   ;;  %s1083_s2 = inlined_call_operand.vmem [shape: bf16[2,4,16,8], index: 2, kind: input, shape index: {}]   ;;  %s1084_s3 = inlined_call_operand.vmem [shape: bf16[2,4,12,8], index: 3, kind: output, shape index: {}]  }
   0x1   :  { %s1004_s14 = smov 0  }
   0x2 LB: > { %s25_s15 = sadd.s32 1, %s974_s13  ;;  %p817_p0 = scmp.ge.s32.totalorder %s978_s14, 1  ;;  %s978_s14 = sphi %s1004_s14, %s13_s14   ;;  %s974_s13 = sphi %s1002_s13, %s1086_s13   ;;  %s970_s12 = sphi %s1000_s12, %s1085_s12  }
   0x3   : > { %p27_p1 = scmp.ge.s32.totalorder %s25_s15, 2  ;;  %p195_p2 = scmp.lt.s32.totalorder %s978_s14, 3 }
   0x5   : > { %s1088_s15 = smov (%p27_p1, %s25_s15), 0  ;;  %p196_p3 = pnand %p817_p0, %p195_p2 }
   0x6   : > { %p250_p4 = scmp.lt.s32.totalorder (!%p196_p3), %s970_s12, 1 }
   0x7   : > { %199 = sbr.rel (%p196_p3) target bundleno = 574 (0x23e), region = 32 }
   0xc   : > { %s1090_s12 = smov (!%p250_p4, %s970_s12), 1  ;;  %vm328_vm0 = vcmask 64512   ;;  %vm447_vm1 = vcmask 130048   ;;  %vm451_vm2 = vcmask 125952   ;;  %vm665_vm3 = vcmask 60416  }
   0xd   : > { %s1018_s16 = sshll.u32 %s1090_s12, 5  ;;  %vm667_vm4 = vcmask 58368  }
   0xe   : > { %s269_s19 = scalar_lea.vmem %s1082_s1, %s1018_s16  ;;  %s258_s22 = scalar_lea.vmem %s1081_s0, %s1018_s16 }
   0xf   : > { %v892_v0 = vld [vmem:[%s269_s19] sm:$0xff]  ;;  %v894_v1 = vld [vmem:[%s269_s19 + $0x10] sm:$0xff]  ;;  %v895_v2 = vld [vmem:[%s269_s19 + $0x18] sm:$0xff]  ;;  %s280_s25 = scalar_lea.vmem %s1083_s2, %s1018_s16  ;;  %s291_s28 = scalar_lea.vmem %s1084_s3, %s1018_s16 }
  0x10   : > { %v893_v3 = vld [vmem:[%s269_s19 + $0x8] sm:$0xff]  ;;  %v828_v4 = vld [vmem:[%s258_s22] sm:$0xf]  ;;  %v888_v5 = vld [vmem:[%s258_s22] sm:$0x30]  ;;  %v333_v6 = vsel %vm328_vm0, %v892_v0, 0 }
  0x11   : > { %v393_v7 = vsel %vm328_vm0, %v894_v1, 0  ;;  %v423_v8 = vsel %vm328_vm0, %v895_v2, 0  ;;  %v846_v9 = vld [vmem:[%s258_s22 + $0x10] sm:$0xf]  ;;  %342 = vmatpush.bf16.xpose.msra.mxu0 %v333_v6  ;;  %v363_v10 = vsel %vm328_vm0, %v893_v3, 0  ;;  %v829_v16 = vor.u32 %v888_v5, %v828_v4 }
  0x12   : > { %402 = vmatpush.bf16.xpose.msra.mxu2 %v393_v7  ;;  %v890_v11 = vld [vmem:[%s258_s22 + $0x10] sm:$0x30]  ;;  %v855_v12 = vld [vmem:[%s258_s22 + $0x18] sm:$0xf]  ;;  %432 = vmatpush.bf16.xpose.msra.mxu3 %v423_v8  ;;  %v891_v13 = vld [vmem:[%s258_s22 + $0x18] sm:$0x30] }
  0x13   : > { %372 = vmatpush.bf16.xpose.msra.mxu1 %v363_v10  ;;  %v837_v14 = vld [vmem:[%s258_s22 + $0x8] sm:$0xf]  ;;  %v889_v15 = vld [vmem:[%s258_s22 + $0x8] sm:$0x30]  ;;  %v847_v17 = vor.u32 %v890_v11, %v846_v9  ;;  %v856_v18 = vor.u32 %v891_v13, %v855_v12 }
  0x14   : > { %v838_v19 = vor.u32 %v889_v15, %v837_v14 }
  0x18   : > { %834 = vmatmul.msk.bf16.vlgmr.msra.gmra.mxu0 %vm328_vm0, %v829_v16 }
  0x19   : > { %852 = vmatmul.msk.bf16.vlgmr.msra.gmra.mxu2 %vm328_vm0, %v847_v17  ;;  %861 = vmatmul.msk.bf16.vlgmr.msra.gmra.mxu3 %vm328_vm0, %v856_v18 }
  0x1a   : > { %843 = vmatmul.msk.bf16.vlgmr.msra.gmra.mxu1 %vm328_vm0, %v838_v19 }
  0x95   : > { %v344_v20 = vpop.f32.mrf.mxu0 }
  0x96   : > { %v439_v21 = vmul.f32 0.35355338, %v344_v20  ;;  %v898_v20 = vld [vmem:[%s280_s25 + $0x10] sm:$0xff] }
  0x97   : > { %v374_v28 = vpop.f32.mrf.mxu1  ;;  %622 = vmatpush.bf16.msrb.mxu2 %v898_v20 }
  0x98   : > { %v448_v22 = vsel %vm447_vm1, %v439_v21, -inf  ;;  %v441_v40 = vmul.f32 0.35355338, %v374_v28 }
  0x99   : > { %449 = vmax.xlane.f32.xlu2 %v448_v22  ;;  %v896_v22 = vld [vmem:[%s280_s25] sm:$0xff] }
  0x9a   : > { %v455_v42 = vsel %vm447_vm1, %v441_v40, -inf  ;;  %566 = vmatpush.bf16.msrb.mxu0 %v896_v22 }
  0x9c   : > { %v404_v23 = vpop.f32.mrf.mxu2  ;;  %v434_v25 = vpop.f32.mrf.mxu3 }
  0x9d   : > { %v443_v24 = vmul.f32 0.35355338, %v404_v23  ;;  %v445_v26 = vmul.f32 0.35355338, %v434_v25  ;;  %v346_v27 = vpop.f32.mrf.mxu0  ;;  %v897_v23 = vld [vmem:[%s280_s25 + $0x8] sm:$0xff] }
  0x9e   : > { %v440_v29 = vmul.f32 0.35355338, %v346_v27  ;;  %594 = vmatpush.bf16.msrb.mxu1 %v897_v23 }
  0x9f   : > { %v461_v30 = vsel %vm447_vm1, %v443_v24, -inf  ;;  %v467_v31 = vsel %vm447_vm1, %v445_v26, -inf  ;;  %v376_v39 = vpop.f32.mrf.mxu1 }
  0xa0   : > { %462 = vmax.xlane.f32.xlu0 %v461_v30  ;;  %468 = vmax.xlane.f32.xlu1 %v467_v31  ;;  %v452_v32 = vsel %vm451_vm2, %v440_v29, -inf  ;;  %v442_v41 = vmul.f32 0.35355338, %v376_v39 }
  0xa1   : > { %453 = vmax.xlane.f32.xlu2 %v452_v32 }
  0xa2   : > { %v458_v43 = vsel %vm451_vm2, %v442_v41, -inf }
  0xa4   : > { %v406_v33 = vpop.f32.mrf.mxu2  ;;  %v436_v35 = vpop.f32.mrf.mxu3 }
  0xa5   : > { %v444_v34 = vmul.f32 0.35355338, %v406_v33  ;;  %v446_v36 = vmul.f32 0.35355338, %v436_v35 }
  0xa7   : > { %v464_v37 = vsel %vm451_vm2, %v444_v34, -inf  ;;  %v470_v38 = vsel %vm451_vm2, %v446_v36, -inf }
  0xa8   : > { %465 = vmax.xlane.f32.xlu0 %v464_v37  ;;  %471 = vmax.xlane.f32.xlu1 %v470_v38 }
  0xb0   : > { %456 = vmax.xlane.f32.xlu0 %v455_v42  ;;  %459 = vmax.xlane.f32.xlu1 %v458_v43 }
 0x10c   : > { %v450_v44 = vpop.xlane.xlu2 %449 }
 0x10d   : > { %v473_v45 = vsub.f32 %v439_v21, %v450_v44  ;;  %v899_v21 = vld [vmem:[%s280_s25 + $0x18] sm:$0xff] }
 0x10e   : > { %650 = vmatpush.bf16.msrb.mxu3 %v899_v21 }
 0x10f   : > { %v481_v46 = vmul.f32 1.442695, %v473_v45 }
 0x111   : > { %924 = vpow2.f32 %v481_v46 }
 0x113   : > { %v463_v47 = vpop.xlane.xlu0 %462  ;;  %v469_v48 = vpop.xlane.xlu1 %468 }
 0x114   : > { %v477_v49 = vsub.f32 %v443_v24, %v463_v47  ;;  %v479_v50 = vsub.f32 %v445_v26, %v469_v48  ;;  %v454_v51 = vpop.xlane.xlu2 %453 }
 0x115   : > { %v474_v54 = vsub.f32 %v440_v29, %v454_v51 }
 0x116   : > { %v489_v52 = vmul.f32 1.442695, %v477_v49  ;;  %v493_v53 = vmul.f32 1.442695, %v479_v50 }
 0x117   : > { %v1044_v55 = vpop.eup %924  ;;  %v483_v57 = vmul.f32 1.442695, %v474_v54 }
 0x118   : > { %926 = vpow2.f32 %v489_v52  ;;  %v497_v56 = vsel %vm447_vm1, %v1044_v55, 0.0 }
 0x119   : > { %928 = vpow2.f32 %v493_v53  ;;  %498 = vadd.xlane.f32.xlu0 %v497_v56 }
 0x11a   : > { %930 = vpow2.f32 %v483_v57 }
 0x11b   : > { %v466_v58 = vpop.xlane.xlu0 %465  ;;  %v472_v59 = vpop.xlane.xlu1 %471 }
 0x11c   : > { %v478_v60 = vsub.f32 %v444_v34, %v466_v58  ;;  %v480_v61 = vsub.f32 %v446_v36, %v472_v59 }
 0x11e   : > { %v927_v62 = vpop.eup %926  ;;  %v491_v63 = vmul.f32 1.442695, %v478_v60  ;;  %v495_v1 = vmul.f32 1.442695, %v480_v61 }
 0x11f   : > { %v929_v0 = vpop.eup %928  ;;  %v509_v2 = vsel %vm447_vm1, %v927_v62, 0.0 }
 0x120   : > { %932 = vpow2.f32 %v491_v63  ;;  %v515_v3 = vsel %vm447_vm1, %v929_v0, 0.0  ;;  %510 = vadd.xlane.f32.xlu2 %v509_v2  ;;  %v931_v7 = vpop.eup %930 }
 0x121   : > { %934 = vpow2.f32 %v495_v1  ;;  %516 = vadd.xlane.f32.xlu1 %v515_v3  ;;  %v500_v15 = vsel %vm451_vm2, %v931_v7, 0.0 }
 0x123   : > { %v457_v4 = vpop.xlane.xlu0 %456  ;;  %v460_v6 = vpop.xlane.xlu1 %459 }
 0x124   : > { %v475_v5 = vsub.f32 %v441_v40, %v457_v4  ;;  %v476_v8 = vsub.f32 %v442_v41, %v460_v6 }
 0x126   : > { %v933_v9 = vpop.eup %932  ;;  %v485_v10 = vmul.f32 1.442695, %v475_v5  ;;  %v487_v12 = vmul.f32 1.442695, %v476_v8 }
 0x127   : > { %v935_v11 = vpop.eup %934  ;;  %v512_v13 = vsel %vm451_vm2, %v933_v9, 0.0 }
 0x128   : > { %936 = vpow2.f32 %v485_v10  ;;  %513 = vadd.xlane.f32.xlu0 %v512_v13  ;;  %v518_v14 = vsel %vm451_vm2, %v935_v11, 0.0 }
 0x129   : > { %938 = vpow2.f32 %v487_v12  ;;  %519 = vadd.xlane.f32.xlu2 %v518_v14  ;;  %501 = vadd.xlane.f32.xlu1 %v500_v15 }
 0x12e   : > { %v1053_v16 = vpop.eup %936 }
 0x12f   : > { %v939_v17 = vpop.eup %938  ;;  %v503_v18 = vsel %vm447_vm1, %v1053_v16, 0.0 }
 0x130   : > { %v506_v19 = vsel %vm451_vm2, %v939_v17, 0.0 }
 0x131   : > { %507 = vadd.xlane.f32.xlu0 %v506_v19  ;;  %504 = vadd.xlane.f32.xlu2 %v503_v18 }
 0x18c   : > { %v499_v24 = vpop.xlane.xlu0 %498 }
 0x193   : > { %v511_v25 = vpop.xlane.xlu2 %510 }
 0x194   : > { %v517_v26 = vpop.xlane.xlu1 %516  ;;  %940 = vrcp.f32 %v511_v25 }
 0x195   : > { %942 = vrcp.f32 %v499_v24 }
 0x196   : > { %944 = vrcp.f32 %v517_v26 }
 0x19a   : > { %v941_v28 = vpop.eup %940 }
 0x19b   : > { %v514_v27 = vpop.xlane.xlu0 %513  ;;  %v943_v31 = vpop.eup %942  ;;  %v533_v33 = vmul.f32 %v941_v28, %v927_v62 }
 0x19c   : > { %946 = vrcp.f32 %v514_v27  ;;  %v502_v29 = vpop.xlane.xlu1 %501  ;;  %v520_v30 = vpop.xlane.xlu2 %519  ;;  %v529_v34 = vmul.f32 %v943_v31, %v1044_v55 }
 0x19d   : > { %948 = vrcp.f32 %v502_v29  ;;  %v945_v32 = vpop.eup %944  ;;  %v541_v38 = vpack.c.bf16 %v533_v33, %v533_v33 }
 0x19e   : > { %950 = vrcp.f32 %v520_v30  ;;  %v535_v35 = vmul.f32 %v945_v32, %v929_v0  ;;  %v537_v41 = vpack.c.bf16 %v529_v34, %v529_v34 }
 0x19f   : > { %v603_v49 = vunpack.c.l.b16 %v541_v38 }
 0x1a0   : > { %v543_v45 = vpack.c.bf16 %v535_v35, %v535_v35  ;;  %v547_v52 = vunpack.c.l.b16 %v537_v41 }
 0x1a2   : > { %v947_v36 = vpop.eup %946  ;;  %v631_v54 = vunpack.c.l.b16 %v543_v45 }
 0x1a3   : > { %v949_v37 = vpop.eup %948  ;;  %v534_v39 = vmul.f32 %v947_v36, %v933_v9 }
 0x1a4   : > { %v951_v40 = vpop.eup %950  ;;  %v530_v42 = vmul.f32 %v949_v37, %v931_v7  ;;  %v508_v43 = vpop.xlane.xlu0 %507 }
 0x1a5   : > { %v505_v44 = vpop.xlane.xlu2 %504  ;;  %v542_v46 = vpack.c.bf16 %v534_v39, %v534_v39  ;;  %v536_v47 = vmul.f32 %v951_v40, %v935_v11  ;;  %952 = vrcp.f32 %v508_v43 }
 0x1a6   : > { %v538_v48 = vpack.c.bf16 %v530_v42, %v530_v42  ;;  %954 = vrcp.f32 %v505_v44 }
 0x1a7   : > { %v604_v50 = vunpack.c.l.b16 %v542_v46  ;;  %v544_v51 = vpack.c.bf16 %v536_v47, %v536_v47 }
 0x1a8   : > { %v548_v53 = vunpack.c.l.b16 %v538_v48 }
 0x1a9   : > { %v632_v55 = vunpack.c.l.b16 %v544_v51  ;;  %v605_v56 = vpack.c.b16 %v604_v50, %v603_v49 }
 0x1aa   : > { %v549_v57 = vpack.c.b16 %v548_v53, %v547_v52 }
 0x1ab   : > { %v953_v58 = vpop.eup %952  ;;  %876 = vmatmul.msk.bf16.vlgmr.msrb.gmra.mxu2 %vm447_vm1, %v605_v56  ;;  %v633_v59 = vpack.c.b16 %v632_v55, %v631_v54 }
 0x1ac   : > { %v955_v60 = vpop.eup %954  ;;  %v532_v61 = vmul.f32 %v953_v58, %v939_v17  ;;  %866 = vmatmul.msk.bf16.vlgmr.msrb.gmra.mxu0 %vm447_vm1, %v549_v57 }
 0x1ad   : > { %v531_v62 = vmul.f32 %v955_v60, %v1053_v16  ;;  %881 = vmatmul.msk.bf16.vlgmr.msrb.gmra.mxu3 %vm447_vm1, %v633_v59 }
 0x1ae   : > { %v540_v63 = vpack.c.bf16 %v532_v61, %v532_v61 }
 0x1af   : > { %v539_v0 = vpack.c.bf16 %v531_v62, %v531_v62 }
 0x1b0   : > { %v576_v1 = vunpack.c.l.b16 %v540_v63 }
 0x1b1   : > { %v575_v2 = vunpack.c.l.b16 %v539_v0 }
 0x1b3   : > { %v577_v3 = vpack.c.b16 %v576_v1, %v575_v2 }
 0x1b5   : > { %871 = vmatmul.msk.bf16.vlgmr.msrb.gmra.mxu1 %vm447_vm1, %v577_v3 }
 0x229   : > { %v568_v4 = vpop.f32.mrf.mxu0 }
 0x22a   : > { %v657_v5 = vpack.c.bf16 %v568_v4, %v568_v4 }
 0x22c   : > { %666 = vst.msk [vmem:[%s291_s28] sm:$0xf] %vm665_vm3, %v657_v5 }
 0x22e   : > { %v624_v6 = vpop.f32.mrf.mxu2 }
 0x22f   : > { %v661_v7 = vpack.c.bf16 %v624_v6, %v624_v6 }
 0x230   : > { %v652_v8 = vpop.f32.mrf.mxu3 }
 0x231   : > { %671 = vst.msk [vmem:[%s291_s28 + $0x10] sm:$0xf] %vm665_vm3, %v661_v7  ;;  %v663_v9 = vpack.c.bf16 %v652_v8, %v652_v8  ;;  %v570_v10 = vpop.f32.mrf.mxu0 }
 0x232   : > { %v658_v11 = vpack.c.bf16 %v570_v10, %v570_v10  ;;  %v596_v12 = vpop.f32.mrf.mxu1 }
 0x233   : > { %673 = vst.msk [vmem:[%s291_s28 + $0x18] sm:$0xf] %vm665_vm3, %v663_v9  ;;  %v659_v13 = vpack.c.bf16 %v596_v12, %v596_v12 }
 0x234   : > { %668 = vst.msk [vmem:[%s291_s28 + $0x4] sm:$0x3] %vm667_vm4, %v658_v11 }
 0x235   : > { %669 = vst.msk [vmem:[%s291_s28 + $0x8] sm:$0xf] %vm665_vm3, %v659_v13 }
 0x236   : > { %v626_v14 = vpop.f32.mrf.mxu2 }
 0x237   : > { %v662_v15 = vpack.c.bf16 %v626_v14, %v626_v14 }
 0x238   : > { %v654_v16 = vpop.f32.mrf.mxu3 }
 0x239   : > { %672 = vst.msk [vmem:[%s291_s28 + $0x14] sm:$0x3] %vm667_vm4, %v662_v15  ;;  %v664_v17 = vpack.c.bf16 %v654_v16, %v654_v16 }
 0x23a   : > { %v598_v18 = vpop.f32.mrf.mxu1 }
 0x23b   : > { %674 = vst.msk [vmem:[%s291_s28 + $0x1c] sm:$0x3] %vm667_vm4, %v664_v17  ;;  %v660_v19 = vpack.c.bf16 %v598_v18, %v598_v18 }
 0x23d   : > { %670 = vst.msk [vmem:[%s291_s28 + $0xc] sm:$0x3] %vm667_vm4, %v660_v19 }
 0x23e PF: > { %s13_s14 = sadd.s32 1, %s978_s14   ;;  %s1085_s12 = smov %s974_s13 }
 0x23f   : > { %p10_p5 = scmp.ge.s32.totalorder %s13_s14, 4   ;;  %s1086_s13 = smov %s1088_s15 }
 0x241   :  { %12 = sbr.rel (!%p10_p5) target bundleno = 2 (0x2), region = 68 }

// kernel: soft_text_decoder_v2_forward.45
= control target key start
LH: loop header
LB: loop body
LE: loop exit
PB: predicated region body
PF: predicated region fallthrough
CT: control target
= control target key end

     0   :  { %vm49_vm0 = vcmask 261120   ;;  %s172_s1 = inlined_call_operand.vmem [shape: bf16[32,128], index: 1, kind: input, shape index: {}]   ;;  %s173_s0 = inlined_call_operand.vmem [shape: bf16[24,32], index: 0, kind: input, shape index: {}]   ;;  %s174_s2 = inlined_call_operand.vmem [shape: f32[1,128], index: 2, kind: input, shape index: {}]   ;;  %s175_s3 = inlined_call_operand.vmem [shape: bf16[24,128], index: 3, kind: output, shape index: {}]  }
   0x1   :  { %v122_v0 = vld [vmem:[%s172_s1 + $0x8] sm:$0xff]  ;;  %v121_v2 = vld [vmem:[%s172_s1] sm:$0xff] }
   0x2   :  { %v24_v1 = vld [vmem:[%s173_s0 + $0x8] sm:$0xf]  ;;  %62 = vmatpush.bf16.msra.mxu0 %v122_v0  ;;  %128 = vmatpush.bf16.msra.mxu1 %v122_v0  ;;  %v120_v4 = vld [vmem:[%s173_s0] sm:$0xff] }
   0x3   :  { %v34_v3 = vunpack.c.l.b16 %v24_v1  ;;  %v130_v6 = vld [vmem:[%s174_s2] ss:$0 sm:$0xff] }
   0x5   :  { %v36_v5 = vpack.c.b16 %v34_v3, %v34_v3 }
   0x6   :  { %63 = vmatpush.bf16.msra.mxu0 %v121_v2  ;;  %129 = vmatpush.bf16.msra.mxu1 %v121_v2 }
   0x9   :  { %118 = vmatmul.msk.bf16.vlgmr.msra.gmra.mxu0 %vm49_vm0, %v120_v4  ;;  %119 = vmatmul.msk.bf16.vlgmr.msra.gmra.mxu1 %vm49_vm0, %v36_v5 }
  0x86   :  { %v65_v7 = vpop.f32.mrf.mxu0  ;;  %v70_v8 = vpop.f32.mrf.mxu1 }
  0x87   :  { %v95_v9 = vadd.f32 %v130_v6, %v70_v8  ;;  %v93_v13 = vadd.f32 %v130_v6, %v65_v7 }
  0x89   :  { %v98_v10 = vpack.c.bf16 %v95_v9, %v95_v9 }
  0x8b   :  { %101 = vst [vmem:[%s175_s3 + $0x8] sm:$0xf] %v98_v10 }
  0x8e   :  { %v67_v11 = vpop.f32.mrf.mxu0  ;;  %v72_v12 = vpop.f32.mrf.mxu1 }
  0x8f   :  { %v94_v14 = vadd.f32 %v130_v6, %v67_v11 }
  0x91   :  { %v126_v15 = vpack.c.bf16 %v94_v14, %v93_v13 }
  0x93   :  { %127 = vst [vmem:[%s175_s3] sm:$0xff] %v126_v15  }

// kernel: soft_text_decoder_v2_forward.46
= control target key start
LH: loop header
LB: loop body
LE: loop exit
PB: predicated region body
PF: predicated region fallthrough
CT: control target
= control target key end

     0   :  { %vm21_vm0 = vcmask 261120   ;;  %v211_v2 = vmov 0.0   ;;  %s297_s1 = inlined_call_operand.vmem [shape: bf16[128,32], index: 1, kind: input, shape index: {}]   ;;  %s298_s2 = inlined_call_operand.vmem [shape: f32[1,32], index: 2, kind: input, shape index: {}]   ;;  %s299_s0 = inlined_call_operand.vmem [shape: bf16[24,128], index: 0, kind: input, shape index: {}]   ;;  %s300_s3 = inlined_call_operand.vmem [shape: f32[24,32], index: 3, kind: input, shape index: {}]   ;;  %s301_s4 = inlined_call_operand.vmem [shape: f32[24,32], index: 4, kind: output, shape index: {}]  }
   0x1   :  { %v200_v0 = vld [vmem:[%s297_s1 + $0x38] sm:$0xff]  ;;  %v199_v1 = vld [vmem:[%s297_s1 + $0x30] sm:$0xff]  ;;  %22 = vst.msk [vmem:[#allocation2] sm:$0xff] %vm21_vm0, %v211_v2  ;;  %v198_v3 = vld [vmem:[%s297_s1 + $0x28] sm:$0xff] }
   0x2   :  { %102 = vmatpush.bf16.msra.mxu0 %v200_v0  ;;  %201 = vmatpush.bf16.msra.mxu1 %v200_v0  ;;  %23 = vst.msk [vmem:[#allocation2 + $0x8] sm:$0xff] %vm21_vm0, %v211_v2  ;;  %v197_v4 = vld [vmem:[%s297_s1 + $0x20] sm:$0xff]  ;;  %v196_v5 = vld [vmem:[%s297_s1 + $0x18] sm:$0xff]  ;;  %v195_v6 = vld [vmem:[%s297_s1 + $0x10] sm:$0xff] }
   0x3   :  { %24 = vst.msk [vmem:[#allocation2 + $0x10] sm:$0xff] %vm21_vm0, %v211_v2  ;;  %v194_v7 = vld [vmem:[%s297_s1 + $0x8] sm:$0xff]  ;;  %v193_v10 = vld [vmem:[%s297_s1] sm:$0xff]  ;;  %v145_v28 = vld [vmem:[%s300_s3 + $0x10] sm:$0xff] }
   0x4   :  { %v27_v8 = vld [vmem:[%s299_s0 + $0x8] sm:$0xf]  ;;  %v192_v11 = vld [vmem:[%s299_s0] sm:$0xff] }
   0x5   :  { %v49_v9 = vunpack.c.l.b16 %v27_v8  ;;  %v210_v20 = vld [vmem:[%s298_s2] ss:$0 sm:$0xff]  ;;  %v144_v33 = vld [vmem:[%s300_s3 + $0x8] sm:$0xff] }
   0x6   :  { %103 = vmatpush.bf16.msra.mxu0 %v199_v1  ;;  %202 = vmatpush.bf16.msra.mxu1 %v199_v1  ;;  %v143_v25 = vld [vmem:[%s300_s3] sm:$0xff] }
   0x7   :  { %v51_v12 = vpack.c.b16 %v49_v9, %v49_v9 }
   0x8   :  { %v120_v13 = vld [vmem:[#allocation2] sm:$0xff] }
   0x9   :  { %v121_v19 = vld [vmem:[#allocation2 + $0x8] sm:$0xff] }
   0xa   :  { %104 = vmatpush.bf16.msra.mxu0 %v198_v3  ;;  %203 = vmatpush.bf16.msra.mxu1 %v198_v3  ;;  %v122_v14 = vld [vmem:[#allocation2 + $0x10] sm:$0xff] }
   0xe   :  { %105 = vmatpush.bf16.msra.mxu0 %v197_v4  ;;  %204 = vmatpush.bf16.msra.mxu1 %v197_v4 }
  0x12   :  { %106 = vmatpush.bf16.msra.mxu0 %v196_v5  ;;  %205 = vmatpush.bf16.msra.mxu1 %v196_v5 }
  0x16   :  { %107 = vmatpush.bf16.msra.mxu0 %v195_v6  ;;  %206 = vmatpush.bf16.msra.mxu1 %v195_v6 }
  0x1a   :  { %108 = vmatpush.bf16.msra.mxu0 %v194_v7  ;;  %207 = vmatpush.bf16.msra.mxu1 %v194_v7 }
  0x1e   :  { %109 = vmatpush.bf16.msra.mxu0 %v193_v10  ;;  %208 = vmatpush.bf16.msra.mxu1 %v193_v10 }
  0x21   :  { %110 = vmatmul.bf16.vlgmr.msra.gmra.mxu0 %v192_v11  ;;  %115 = vmatmul.bf16.vlgmr.msra.gmra.mxu1 %v51_v12 }
  0x9e   :  { %v111_v15 = vpop.f32.mrf.mxu0  ;;  %v116_v16 = vpop.f32.mrf.mxu1 }
  0x9f   :  { %v123_v17 = vadd.f32 %v120_v13, %v111_v15  ;;  %v125_v18 = vadd.f32 %v122_v14, %v116_v16 }
  0xa1   :  { %127 = vst.msk [vmem:[#allocation2] sm:$0xff] %vm21_vm0, %v123_v17 }
  0xa2   :  { %129 = vst.msk [vmem:[#allocation2 + $0x10] sm:$0xff] %vm21_vm0, %v125_v18 }
  0xa6   :  { %v113_v21 = vpop.f32.mrf.mxu0  ;;  %v118_v22 = vpop.f32.mrf.mxu1 }
  0xa7   :  { %v124_v23 = vadd.f32 %v121_v19, %v113_v21 }
  0xa8   :  { %v133_v24 = vld [vmem:[#allocation2] sm:$0xff] }
  0xa9   :  { %v140_v26 = vadd.f32 %v210_v20, %v133_v24  ;;  %v135_v27 = vld [vmem:[#allocation2 + $0x10] sm:$0xff]  ;;  %128 = vst.msk [vmem:[#allocation2 + $0x8] sm:$0xff] %vm21_vm0, %v124_v23 }
  0xaa   :  { %v142_v29 = vadd.f32 %v210_v20, %v135_v27 }
  0xab   :  { %v146_v30 = vadd.f32 %v143_v25, %v140_v26 }
  0xac   :  { %v148_v31 = vadd.f32 %v145_v28, %v142_v29 }
  0xad   :  { %149 = vst.msk [vmem:[%s301_s4] sm:$0xff] %vm21_vm0, %v146_v30 }
  0xae   :  { %151 = vst.msk [vmem:[%s301_s4 + $0x10] sm:$0xff] %vm21_vm0, %v148_v31 }
  0xb0   :  { %v134_v32 = vld [vmem:[#allocation2 + $0x8] sm:$0xff] }
  0xb1   :  { %v141_v34 = vadd.f32 %v210_v20, %v134_v32 }
  0xb3   :  { %v147_v35 = vadd.f32 %v144_v33, %v141_v34 }
  0xb5   :  { %150 = vst.msk [vmem:[%s301_s4 + $0x8] sm:$0xff] %vm21_vm0, %v147_v35 }

// kernel: soft_text_decoder_v2_forward.63
= control target key start
LH: loop header
LB: loop body
LE: loop exit
PB: predicated region body
PF: predicated region fallthrough
CT: control target
= control target key end

     0   :  { %vm73_vm0 = vcmask 261120   ;;  %vm16_vm1 = vcmask 785408   ;;  %v183_v6 = vmov 0.0   ;;  %s249_s1 = inlined_call_operand.vmem [shape: bf16[96,32], index: 1, kind: input, shape index: {}]   ;;  %s250_s0 = inlined_call_operand.vmem [shape: bf16[24,32], index: 0, kind: input, shape index: {}]   ;;  %s251_s2 = inlined_call_operand.vmem [shape: f32[24,96], index: 2, kind: output, shape index: {}]  }
   0x1   :  { %v175_v0 = vld [vmem:[%s249_s1 + $0x28] sm:$0xff]  ;;  %v174_v2 = vld [vmem:[%s249_s1 + $0x20] sm:$0xff]  ;;  %v173_v4 = vld [vmem:[%s249_s1 + $0x18] sm:$0xff]  ;;  %17 = vst.msk [vmem:[#allocation2] sm:$0xff] %vm16_vm1, %v183_v6 }
   0x2   :  { %v96_v1 = vsel %vm73_vm0, %v175_v0, 0  ;;  %v93_v3 = vsel %vm73_vm0, %v174_v2, 0  ;;  %v90_v5 = vsel %vm73_vm0, %v173_v4, 0  ;;  %v172_v7 = vld [vmem:[%s249_s1 + $0x10] sm:$0xff]  ;;  %18 = vst.msk [vmem:[#allocation2 + $0x8] sm:$0xff] %vm16_vm1, %v183_v6  ;;  %v171_v9 = vld [vmem:[%s249_s1 + $0x8] sm:$0xff] }
   0x3   :  { %100 = vmatpush.bf16.xpose.msra.mxu0 %v96_v1  ;;  %176 = vmatpush.bf16.xpose.msra.mxu1 %v96_v1  ;;  %19 = vst.msk [vmem:[#allocation2 + $0x10] sm:$0xff] %vm16_vm1, %v183_v6  ;;  %v87_v8 = vsel %vm73_vm0, %v172_v7, 0  ;;  %v84_v10 = vsel %vm73_vm0, %v171_v9, 0  ;;  %v170_v11 = vld [vmem:[%s249_s1] sm:$0xff]  ;;  %v22_v12 = vld [vmem:[%s250_s0 + $0x8] sm:$0xf] }
   0x4   :  { %v81_v13 = vsel %vm73_vm0, %v170_v11, 0  ;;  %v40_v14 = vunpack.c.l.b16 %v22_v12  ;;  %v169_v15 = vld [vmem:[%s250_s0] sm:$0xff] }
   0x6   :  { %v42_v16 = vpack.c.b16 %v40_v14, %v40_v14 }
   0x8   :  { %v116_v17 = vld [vmem:[#allocation2] sm:$0xff] }
   0x9   :  { %v117_v23 = vld [vmem:[#allocation2 + $0x8] sm:$0xff] }
   0xa   :  { %v118_v18 = vld [vmem:[#allocation2 + $0x10] sm:$0xff] }
   0xb   :  { %101 = vmatpush.bf16.xpose.msra.mxu0 %v93_v3  ;;  %177 = vmatpush.bf16.xpose.msra.mxu1 %v93_v3 }
  0x13   :  { %102 = vmatpush.bf16.xpose.msra.mxu0 %v90_v5  ;;  %178 = vmatpush.bf16.xpose.msra.mxu1 %v90_v5 }
  0x1b   :  { %103 = vmatpush.bf16.xpose.msra.mxu0 %v87_v8  ;;  %179 = vmatpush.bf16.xpose.msra.mxu1 %v87_v8 }
  0x23   :  { %104 = vmatpush.bf16.xpose.msra.mxu0 %v84_v10  ;;  %180 = vmatpush.bf16.xpose.msra.mxu1 %v84_v10 }
  0x2b   :  { %105 = vmatpush.bf16.xpose.msra.mxu0 %v81_v13  ;;  %181 = vmatpush.bf16.xpose.msra.mxu1 %v81_v13 }
  0x32   :  { %167 = vmatmul.msk.bf16.vlgmr.msra.gmra.mxu0 %vm73_vm0, %v169_v15  ;;  %168 = vmatmul.msk.bf16.vlgmr.msra.gmra.mxu1 %vm73_vm0, %v42_v16 }
  0xaf   :  { %v107_v19 = vpop.f32.mrf.mxu0  ;;  %v112_v20 = vpop.f32.mrf.mxu1 }
  0xb0   :  { %v119_v21 = vadd.f32 %v116_v17, %v107_v19  ;;  %v121_v22 = vadd.f32 %v118_v18, %v112_v20 }
  0xb2   :  { %123 = vst.msk [vmem:[#allocation2] sm:$0xff] %vm16_vm1, %v119_v21 }
  0xb3   :  { %125 = vst.msk [vmem:[#allocation2 + $0x10] sm:$0xff] %vm16_vm1, %v121_v22 }
  0xb7   :  { %v109_v24 = vpop.f32.mrf.mxu0  ;;  %v114_v25 = vpop.f32.mrf.mxu1 }
  0xb8   :  { %v120_v26 = vadd.f32 %v117_v23, %v109_v24 }
  0xb9   :  { %v129_v27 = vld [vmem:[#allocation2] sm:$0xff] }
  0xba   :  { %132 = vst.msk [vmem:[%s251_s2] sm:$0xff] %vm16_vm1, %v129_v27  ;;  %v131_v28 = vld [vmem:[#allocation2 + $0x10] sm:$0xff] }
  0xbb   :  { %134 = vst.msk [vmem:[%s251_s2 + $0x10] sm:$0xff] %vm16_vm1, %v131_v28 }
  0xbc   :  { %124 = vst.msk [vmem:[#allocation2 + $0x8] sm:$0xff] %vm16_vm1, %v120_v26 }
  0xc3   :  { %v130_v29 = vld [vmem:[#allocation2 + $0x8] sm:$0xff] }
  0xc4   :  { %133 = vst.msk [vmem:[%s251_s2 + $0x8] sm:$0xff] %vm16_vm1, %v130_v29 }

</bundles_post_ra>
